<compile_context>
chip_gen: v7x
topology: tpu7x:2x2x1
jax: 0.10.0
libtpu: 0.0.40
codegen_flags: <defaults>
</compile_context>

<pallas_src>
import functools

import jax
import jax.numpy as jnp
from jax.experimental import pallas as pl
from jax.experimental.pallas import tpu as pltpu

LANE = 128


def _round_up(x, m):
    return (x + m - 1) // m * m


def _resident(shape):
    """BlockSpec for a small weight/bias that is fully resident every grid step."""
    zeros = (0,) * len(shape)
    return pl.BlockSpec(shape, lambda b, z=zeros: z)


def _vmem_limit_bytes():
    """~3/4 of physical VMEM (48 MiB on v7x, 96 MiB on v5e/v6e), capped at 100 MiB."""
    try:
        cap = int(pltpu.get_tpu_info().vmem_capacity_bytes)
    except Exception:                                   # query unavailable -> be safe
        cap = 64 * 1024 * 1024
    return int(max(min(cap - cap // 4, 100 * 1024 * 1024), 32 * 1024 * 1024))


def fold_bn(gamma, beta, mean, var, eps=1e-5):
    """Fold BN running stats into per-channel (scale, bias), f32, unpadded."""
    s = gamma / jnp.sqrt(var + eps)
    b = beta - mean * s
    return s.astype(jnp.float32), b.astype(jnp.float32)


# ---------------------------------------------------------------------------
# Fused bottleneck kernel (one batch element per grid step)
# ---------------------------------------------------------------------------
def bottleneck_kernel(x_ref, w1_ref, b1_ref,
                      w2_ref, b0_ref,
                      fc1w_ref, fc1b_ref,
                      fc2w_ref, fc2b_ref,
                      w3_ref, b3_ref,
                      o_ref, pad_ref, *, h, w):
    hw = h * w
    gwp = pad_ref.shape[-1]               # padded group width (multiple of 128)

    x_bf = x_ref[...]                     # (HW, Cp) bf16 (also the residual)

    # ---- conv1 (1x1, BN scale folded into weight) + bias + relu ------------
    t1 = jnp.dot(x_bf, w1_ref[...], preferred_element_type=jnp.float32)
    t1 = jnp.maximum(t1 + b1_ref[...], 0.0)                         # (HW, GWp) f32

    # ---- halo tile: zero ONLY the 1-pixel border (interior overwritten) ----
    zrow = jnp.zeros((1, w + 2, gwp), dtype=pad_ref.dtype)
    pad_ref[0:1, :, :] = zrow
    pad_ref[h + 1:h + 2, :, :] = zrow
    zcol = jnp.zeros((h, 1, gwp), dtype=pad_ref.dtype)
    pad_ref[1:h + 1, 0:1, :] = zcol
    pad_ref[1:h + 1, w + 1:w + 2, :] = zcol
    pad_ref[1:h + 1, 1:w + 1, :] = t1.reshape(h, w, gwp)

    # ---- conv2 (3x3, padding=1) as 9 accumulated MXU matmuls ---------------
    # No im2col patch matrix: each tap is a shifted view of the halo tile.
    acc = jnp.zeros((hw, gwp), jnp.float32)
    for dy in range(3):
        for dx in range(3):
            tap = dy * 3 + dx
            tap_m = (pad_ref[dy:dy + h, dx:dx + w, :]
                     .reshape(hw, gwp)
                     .astype(jnp.bfloat16))
            acc = acc + jnp.dot(tap_m, w2_ref[tap],
                                preferred_element_type=jnp.float32)
    y = jnp.maximum(acc + b0_ref[...], 0.0)                         # (HW, GWp) f32

    # ---- split-attention (radix == 1): GAP -> fc1(+bn folded) -> relu -> fc2 -> sigmoid
    gap = jnp.sum(y, axis=0, keepdims=True) * (1.0 / hw)            # (1, GWp) f32
    z = jnp.dot(gap.astype(jnp.bfloat16), fc1w_ref[...],
                preferred_element_type=jnp.float32) + fc1b_ref[...]
    z = jnp.maximum(z, 0.0)                                         # (1, INTp)
    a = jnp.dot(z.astype(jnp.bfloat16), fc2w_ref[...],
                preferred_element_type=jnp.float32) + fc2b_ref[...]
    a = jax.nn.sigmoid(a)                                           # (1, GWp), EUP

    out2 = (y * a).astype(jnp.bfloat16)                             # broadcast scale

    # ---- conv3 (1x1, BN scale folded) + bias + residual add + relu ---------
    o = jnp.dot(out2, w3_ref[...], preferred_element_type=jnp.float32)
    o = o + b3_ref[...] + x_bf.astype(jnp.float32)
    o_ref[...] = jnp.maximum(o, 0.0).astype(o_ref.dtype)            # bf16 store


# ---------------------------------------------------------------------------
# Wrapper
# ---------------------------------------------------------------------------
def bottleneck_forward(x_nchw, params, eps=1e-5):
    N, Cin, H, W = x_nchw.shape
    HW = H * W

    gw = params["conv1_w"].shape[0]           # group width
    inter = params["fc1_w"].shape[0]          # attention hidden width
    Cout = params["conv3_w"].shape[0]         # planes * 4
    assert Cin == Cout, "identity residual requires inplanes == planes*4 (downsample=None)"

    Cp = _round_up(Cin, LANE)                 # padded in/out channels
    GWp = _round_up(gw, LANE)                 # padded group width
    INTp = _round_up(inter, LANE)             # padded attention hidden width

    f32, bf16 = jnp.float32, jnp.bfloat16

    # ---- activations: NCHW -> (N, HW, Cp) bf16, layout conversion done in bf16
    x_flat = jnp.transpose(x_nchw.astype(bf16), (0, 2, 3, 1)).reshape(N, HW, Cin)
    x_flat = jnp.pad(x_flat, ((0, 0), (0, 0), (0, Cp - Cin)))

    # ---- conv1 / bn1: scale folded into weight columns ----------------------
    s1, b1v = fold_bn(params["bn1_g"], params["bn1_b"],
                      params["bn1_m"], params["bn1_v"], eps)
    w1 = (params["conv1_w"][:, :, 0, 0] * s1[:, None]).T             # (Cin, gw)
    w1 = jnp.pad(w1, ((0, Cp - Cin), (0, GWp - gw))).astype(bf16)
    b1 = jnp.pad(b1v, (0, GWp - gw))[None, :].astype(f32)

    # ---- conv2 (3x3) / bn0: tap-major (9, GWp, GWp), scale folded -----------
    s0, b0v = fold_bn(params["bn0_g"], params["bn0_b"],
                      params["bn0_m"], params["bn0_v"], eps)
    w2 = params["conv2_w"] * s0[:, None, None, None]                  # (gw, gw, 3, 3)
    w2 = jnp.transpose(w2, (2, 3, 1, 0))                              # (3, 3, in, out)
    w2 = jnp.pad(w2, ((0, 0), (0, 0), (0, GWp - gw), (0, GWp - gw)))
    w2 = w2.reshape(9, GWp, GWp).astype(bf16)
    b0 = jnp.pad(b0v, (0, GWp - gw))[None, :].astype(f32)

    # ---- attention fc path: bnA scale folded into fc1 weight + bias ---------
    sA, bAv = fold_bn(params["bnA_g"], params["bnA_b"],
                      params["bnA_m"], params["bnA_v"], eps)
    fc1w = (params["fc1_w"][:, :, 0, 0] * sA[:, None]).T              # (gw, inter)
    fc1w = jnp.pad(fc1w, ((0, GWp - gw), (0, INTp - inter))).astype(bf16)
    fc1b = jnp.pad(params["fc1_b"] * sA + bAv,
                   (0, INTp - inter))[None, :].astype(f32)
    fc2w = params["fc2_w"][:, :, 0, 0].T                              # (inter, gw)
    fc2w = jnp.pad(fc2w, ((0, INTp - inter), (0, GWp - gw))).astype(bf16)
    fc2b = jnp.pad(params["fc2_b"], (0, GWp - gw))[None, :].astype(f32)

    # ---- conv3 / bn3: scale folded -------------------------------------------
    s3, b3v = fold_bn(params["bn3_g"], params["bn3_b"],
                      params["bn3_m"], params["bn3_v"], eps)
    w3 = (params["conv3_w"][:, :, 0, 0] * s3[:, None]).T              # (gw, Cout)
    w3 = jnp.pad(w3, ((0, GWp - gw), (0, Cp - Cout))).astype(bf16)
    b3 = jnp.pad(b3v, (0, Cp - Cout))[None, :].astype(f32)

    kern = functools.partial(bottleneck_kernel, h=H, w=W)

    out_flat = pl.pallas_call(
        kern,
        out_shape=jax.ShapeDtypeStruct((N, HW, Cp), jnp.bfloat16),
        grid_spec=pltpu.PrefetchScalarGridSpec(
            num_scalar_prefetch=0,
            grid=(N,),
            in_specs=[
                pl.BlockSpec((None, HW, Cp), lambda b: (b, 0, 0)),   # x / residual
                _resident((Cp, GWp)),                                # w1 (scale-folded)
                _resident((1, GWp)),                                 # b1
                _resident((9, GWp, GWp)),                            # w2 (scale-folded)
                _resident((1, GWp)),                                 # b0
                _resident((GWp, INTp)),                              # fc1w (scale-folded)
                _resident((1, INTp)),                                # fc1b (bn folded)
                _resident((INTp, GWp)),                              # fc2w
                _resident((1, GWp)),                                 # fc2b
                _resident((GWp, Cp)),                                # w3 (scale-folded)
                _resident((1, Cp)),                                  # b3
            ],
            out_specs=pl.BlockSpec((None, HW, Cp), lambda b: (b, 0, 0)),
            scratch_shapes=[
                pltpu.VMEM((H + 2, W + 2, GWp), jnp.float32),        # halo tile
            ]),
        compiler_params=pltpu.CompilerParams(
            dimension_semantics=("parallel",),       # megacore: split batch over TCs
            vmem_limit_bytes=_vmem_limit_bytes()),   # generation-aware limit
    )(x_flat, w1, b1, w2, b0, fc1w, fc1b, fc2w, fc2b, w3, b3)

    # strip channel padding, back to f32 NCHW
    out = out_flat[:, :, :Cout].astype(f32).reshape(N, H, W, Cout)
    return jnp.transpose(out, (0, 3, 1, 2))


# ---------------------------------------------------------------------------
# Pure-JAX f32 reference (same inference semantics) for tolerance checking
# ---------------------------------------------------------------------------
def reference_forward(x, p, eps=1e-5):
    dn = ("NCHW", "OIHW", "NCHW")

    def bn(t, g, b, m, v):
        s = g / jnp.sqrt(v + eps)
        return t * s[None, :, None, None] + (b - m * s)[None, :, None, None]

    t = jax.lax.conv_general_dilated(x, p["conv1_w"], (1, 1), "VALID",
                                     dimension_numbers=dn)
    t = jax.nn.relu(bn(t, p["bn1_g"], p["bn1_b"], p["bn1_m"], p["bn1_v"]))
    y = jax.lax.conv_general_dilated(t, p["conv2_w"], (1, 1), ((1, 1), (1, 1)),
                                     dimension_numbers=dn)
    y = jax.nn.relu(bn(y, p["bn0_g"], p["bn0_b"], p["bn0_m"], p["bn0_v"]))
    gap = jnp.mean(y, axis=(2, 3))                                   # (N, gw)
    z = gap @ p["fc1_w"][:, :, 0, 0].T + p["fc1_b"]
    sA = p["bnA_g"] / jnp.sqrt(p["bnA_v"] + eps)
    z = jax.nn.relu(z * sA + (p["bnA_b"] - p["bnA_m"] * sA))
    a = jax.nn.sigmoid(z @ p["fc2_w"][:, :, 0, 0].T + p["fc2_b"])    # (N, gw)
    out2 = y * a[:, :, None, None]
    o = jax.lax.conv_general_dilated(out2, p["conv3_w"], (1, 1), "VALID",
                                     dimension_numbers=dn)
    o = bn(o, p["bn3_g"], p["bn3_b"], p["bn3_m"], p["bn3_v"]) + x
    return jax.nn.relu(o)


# ---------------------------------------------------------------------------
# Parameter init (same toy config as before)
# ---------------------------------------------------------------------------
def init_params(key, inplanes, planes, cardinality=1, bottleneck_width=64,
                radix=1, reduction_factor=4):
    gw = int(planes * (bottleneck_width / 64.0)) * cardinality
    inter = max(gw * radix // reduction_factor, 32)
    out_c = planes * 4
    ks = jax.random.split(key, 24)

    def rn(k, shape, scale=0.1):
        return scale * jax.random.normal(k, shape, dtype=jnp.float32)

    def bn(k0, k1, k2, k3, c):
        return (1.0 + 0.1 * jax.random.normal(ks[k0], (c,), dtype=jnp.float32),
                rn(ks[k1], (c,)),
                rn(ks[k2], (c,)),
                1.0 + jnp.abs(rn(ks[k3], (c,))))

    p = {}
    p["conv1_w"] = rn(ks[0], (gw, inplanes, 1, 1))
    p["bn1_g"], p["bn1_b"], p["bn1_m"], p["bn1_v"] = bn(1, 2, 3, 4, gw)
    p["conv2_w"] = rn(ks[5], (gw * radix, gw, 3, 3))        # groups=1 (card=radix=1)
    p["bn0_g"], p["bn0_b"], p["bn0_m"], p["bn0_v"] = bn(6, 7, 8, 9, gw * radix)
    p["fc1_w"] = rn(ks[10], (inter, gw, 1, 1))
    p["fc1_b"] = rn(ks[11], (inter,))
    p["bnA_g"], p["bnA_b"], p["bnA_m"], p["bnA_v"] = bn(12, 13, 14, 15, inter)
    p["fc2_w"] = rn(ks[16], (gw * radix, inter, 1, 1))
    p["fc2_b"] = rn(ks[17], (gw * radix,))
    p["conv3_w"] = rn(ks[18], (out_c, gw, 1, 1))
    p["bn3_g"], p["bn3_b"], p["bn3_m"], p["bn3_v"] = bn(19, 20, 21, 22, out_c)
    return p


if __name__ == "__main__":
    key = jax.random.PRNGKey(0)
    kx, kp = jax.random.split(key)

    # small shapes: batch=2, inplanes=16 (= planes*4, so identity residual is
    # valid with downsample=None), planes=4, spatial 8x8
    N, inplanes, H, W = 2, 16, 8, 8
    planes = 4

    x = jax.random.normal(kx, (N, inplanes, H, W), dtype=jnp.float32)
    params = init_params(kp, inplanes, planes)

    out = bottleneck_forward(x, params)
    jax.block_until_ready(out)
    assert out.shape == (N, planes * 4, H, W)
    assert bool(jnp.all(jnp.isfinite(out)))

    # tolerance-based comparison against the pure-JAX f32 reference
    ref = reference_forward(x, params)
    err = float(jnp.max(jnp.abs(out - ref)))
    scale = float(jnp.max(jnp.abs(ref)))
    assert err <= 5e-2 * scale + 5e-2, f"max abs err {err} (ref scale {scale})"

    print("KERNEL_OK")
</pallas_src>

<mosaic_0001>
module attributes {stable_mosaic.version = 11 : i64} {
  func.func @bottleneck_kernel(%arg0: i32, %arg1: memref<1x64x128xbf16, #tpu.memory_space<vmem>>, %arg2: memref<128x128xbf16, #tpu.memory_space<vmem>>, %arg3: memref<1x128xf32, #tpu.memory_space<vmem>>, %arg4: memref<9x128x128xbf16, #tpu.memory_space<vmem>>, %arg5: memref<1x128xf32, #tpu.memory_space<vmem>>, %arg6: memref<128x128xbf16, #tpu.memory_space<vmem>>, %arg7: memref<1x128xf32, #tpu.memory_space<vmem>>, %arg8: memref<128x128xbf16, #tpu.memory_space<vmem>>, %arg9: memref<1x128xf32, #tpu.memory_space<vmem>>, %arg10: memref<128x128xbf16, #tpu.memory_space<vmem>>, %arg11: memref<1x128xf32, #tpu.memory_space<vmem>>, %arg12: memref<1x64x128xbf16, #tpu.memory_space<vmem>>, %arg13: memref<10x10x128xf32, #tpu.memory_space<vmem>>) attributes {dimension_semantics = [#tpu.dimension_semantics<parallel>], iteration_bounds = array<i64: 2>, scalar_prefetch = 0 : i64, scratch_operands = 1 : i64, tpu.core_type = #tpu.core_type<tc>, window_params = [{transform_indices = @transform_0, window_bounds = array<i64: 1, 64, 128>}, {pipeline_mode = #tpu.pipeline_mode<synchronous>, transform_indices = @transform_1, window_bounds = array<i64: 128, 128>}, {pipeline_mode = #tpu.pipeline_mode<synchronous>, transform_indices = @transform_2, window_bounds = array<i64: 1, 128>}, {pipeline_mode = #tpu.pipeline_mode<synchronous>, transform_indices = @transform_3, window_bounds = array<i64: 9, 128, 128>}, {pipeline_mode = #tpu.pipeline_mode<synchronous>, transform_indices = @transform_4, window_bounds = array<i64: 1, 128>}, {pipeline_mode = #tpu.pipeline_mode<synchronous>, transform_indices = @transform_5, window_bounds = array<i64: 128, 128>}, {pipeline_mode = #tpu.pipeline_mode<synchronous>, transform_indices = @transform_6, window_bounds = array<i64: 1, 128>}, {pipeline_mode = #tpu.pipeline_mode<synchronous>, transform_indices = @transform_7, window_bounds = array<i64: 128, 128>}, {pipeline_mode = #tpu.pipeline_mode<synchronous>, transform_indices = @transform_8, window_bounds = array<i64: 1, 128>}, {pipeline_mode = #tpu.pipeline_mode<synchronous>, transform_indices = @transform_9, window_bounds = array<i64: 128, 128>}, {pipeline_mode = #tpu.pipeline_mode<synchronous>, transform_indices = @transform_10, window_bounds = array<i64: 1, 128>}, {transform_indices = @transform_11, window_bounds = array<i64: 1, 64, 128>}]} {
    %c0 = arith.constant 0 : index
    %c0_0 = arith.constant 0 : index
    %c0_1 = arith.constant 0 : index
    %0 = vector.load %arg1[%c0, %c0_0, %c0_1] : memref<1x64x128xbf16, #tpu.memory_space<vmem>>, vector<1x64x128xbf16>
    %1 = vector.shape_cast %0 : vector<1x64x128xbf16> to vector<64x128xbf16>
    %c0_2 = arith.constant 0 : index
    %c0_3 = arith.constant 0 : index
    %2 = vector.load %arg2[%c0_2, %c0_3] : memref<128x128xbf16, #tpu.memory_space<vmem>>, vector<128x128xbf16>
    %cst = arith.constant dense<0.000000e+00> : vector<64x128xf32>
    %3 = tpu.matmul %1, %2, %cst {dimension_numbers = #tpu.dot_dimension_numbers<[1], [0], [0], [1], [0, 0, 1, 1], [], []>} : vector<64x128xbf16>, vector<128x128xbf16>, vector<64x128xf32> -> vector<64x128xf32>
    %c0_4 = arith.constant 0 : index
    %c0_5 = arith.constant 0 : index
    %4 = vector.load %arg3[%c0_4, %c0_5] : memref<1x128xf32, #tpu.memory_space<vmem>>, vector<1x128xf32>
    %5 = vector.broadcast %4 : vector<1x128xf32> to vector<64x128xf32>
    %6 = arith.addf %3, %5 : vector<64x128xf32>
    %cst_6 = arith.constant 0.000000e+00 : f32
    %7 = vector.broadcast %cst_6 : f32 to vector<64x128xf32>
    %8 = arith.maximumf %6, %7 : vector<64x128xf32>
    %cst_7 = arith.constant 0.000000e+00 : f32
    %9 = vector.broadcast %cst_7 : f32 to vector<1x10x128xf32>
    %c0_8 = arith.constant 0 : index
    %c0_9 = arith.constant 0 : index
    %c0_10 = arith.constant 0 : index
    %10 = vector.load %arg13[%c0_8, %c0_9, %c0_10] : memref<10x10x128xf32, #tpu.memory_space<vmem>>, vector<1x10x128xf32>
    tpu.vector_store %arg13[%c0_8, %c0_9, %c0_10], %9 {strides = array<i32>} : memref<10x10x128xf32, #tpu.memory_space<vmem>>, vector<1x10x128xf32>,
    %c9 = arith.constant 9 : index
    %c0_11 = arith.constant 0 : index
    %c0_12 = arith.constant 0 : index
    %11 = vector.load %arg13[%c9, %c0_11, %c0_12] : memref<10x10x128xf32, #tpu.memory_space<vmem>>, vector<1x10x128xf32>
    tpu.vector_store %arg13[%c9, %c0_11, %c0_12], %9 {strides = array<i32>} : memref<10x10x128xf32, #tpu.memory_space<vmem>>, vector<1x10x128xf32>,
    %cst_13 = arith.constant 0.000000e+00 : f32
    %12 = vector.broadcast %cst_13 : f32 to vector<8x1x128xf32>
    %c1 = arith.constant 1 : index
    %c0_14 = arith.constant 0 : index
    %c0_15 = arith.constant 0 : index
    %13 = vector.load %arg13[%c1, %c0_14, %c0_15] : memref<10x10x128xf32, #tpu.memory_space<vmem>>, vector<8x1x128xf32>
    tpu.vector_store %arg13[%c1, %c0_14, %c0_15], %12 {strides = array<i32>} : memref<10x10x128xf32, #tpu.memory_space<vmem>>, vector<8x1x128xf32>,
    %c1_16 = arith.constant 1 : index
    %c9_17 = arith.constant 9 : index
    %c0_18 = arith.constant 0 : index
    %14 = vector.load %arg13[%c1_16, %c9_17, %c0_18] : memref<10x10x128xf32, #tpu.memory_space<vmem>>, vector<8x1x128xf32>
    tpu.vector_store %arg13[%c1_16, %c9_17, %c0_18], %12 {strides = array<i32>} : memref<10x10x128xf32, #tpu.memory_space<vmem>>, vector<8x1x128xf32>,
    %15 = vector.shape_cast %8 : vector<64x128xf32> to vector<8x8x128xf32>
    %c1_19 = arith.constant 1 : index
    %c1_20 = arith.constant 1 : index
    %c0_21 = arith.constant 0 : index
    %16 = vector.load %arg13[%c1_19, %c1_20, %c0_21] : memref<10x10x128xf32, #tpu.memory_space<vmem>>, vector<8x8x128xf32>
    tpu.vector_store %arg13[%c1_19, %c1_20, %c0_21], %15 {strides = array<i32>} : memref<10x10x128xf32, #tpu.memory_space<vmem>>, vector<8x8x128xf32>,
    %cst_22 = arith.constant 0.000000e+00 : f32
    %17 = vector.broadcast %cst_22 : f32 to vector<64x128xf32>
    %c0_23 = arith.constant 0 : index
    %c0_24 = arith.constant 0 : index
    %c0_25 = arith.constant 0 : index
    %18 = vector.load %arg13[%c0_23, %c0_24, %c0_25] : memref<10x10x128xf32, #tpu.memory_space<vmem>>, vector<8x8x128xf32>
    %19 = vector.shape_cast %18 : vector<8x8x128xf32> to vector<64x128xf32>
    %20 = arith.truncf %19 : vector<64x128xf32> to vector<64x128xbf16>
    %c0_26 = arith.constant 0 : index
    %c0_27 = arith.constant 0 : index
    %c0_28 = arith.constant 0 : index
    %21 = vector.load %arg4[%c0_26, %c0_27, %c0_28] : memref<9x128x128xbf16, #tpu.memory_space<vmem>>, vector<1x128x128xbf16>
    %22 = vector.shape_cast %21 : vector<1x128x128xbf16> to vector<128x128xbf16>
    %cst_29 = arith.constant dense<0.000000e+00> : vector<64x128xf32>
    %23 = tpu.matmul %20, %22, %cst_29 {dimension_numbers = #tpu.dot_dimension_numbers<[1], [0], [0], [1], [0, 0, 1, 1], [], []>} : vector<64x128xbf16>, vector<128x128xbf16>, vector<64x128xf32> -> vector<64x128xf32>
    %24 = arith.addf %17, %23 : vector<64x128xf32>
    %c0_30 = arith.constant 0 : index
    %c1_31 = arith.constant 1 : index
    %c0_32 = arith.constant 0 : index
    %25 = vector.load %arg13[%c0_30, %c1_31, %c0_32] : memref<10x10x128xf32, #tpu.memory_space<vmem>>, vector<8x8x128xf32>
    %26 = vector.shape_cast %25 : vector<8x8x128xf32> to vector<64x128xf32>
    %27 = arith.truncf %26 : vector<64x128xf32> to vector<64x128xbf16>
    %c1_33 = arith.constant 1 : index
    %c0_34 = arith.constant 0 : index
    %c0_35 = arith.constant 0 : index
    %28 = vector.load %arg4[%c1_33, %c0_34, %c0_35] : memref<9x128x128xbf16, #tpu.memory_space<vmem>>, vector<1x128x128xbf16>
    %29 = vector.shape_cast %28 : vector<1x128x128xbf16> to vector<128x128xbf16>
    %cst_36 = arith.constant dense<0.000000e+00> : vector<64x128xf32>
    %30 = tpu.matmul %27, %29, %cst_36 {dimension_numbers = #tpu.dot_dimension_numbers<[1], [0], [0], [1], [0, 0, 1, 1], [], []>} : vector<64x128xbf16>, vector<128x128xbf16>, vector<64x128xf32> -> vector<64x128xf32>
    %31 = arith.addf %24, %30 : vector<64x128xf32>
    %c0_37 = arith.constant 0 : index
    %c2 = arith.constant 2 : index
    %c0_38 = arith.constant 0 : index
    %32 = vector.load %arg13[%c0_37, %c2, %c0_38] : memref<10x10x128xf32, #tpu.memory_space<vmem>>, vector<8x8x128xf32>
    %33 = vector.shape_cast %32 : vector<8x8x128xf32> to vector<64x128xf32>
    %34 = arith.truncf %33 : vector<64x128xf32> to vector<64x128xbf16>
    %c2_39 = arith.constant 2 : index
    %c0_40 = arith.constant 0 : index
    %c0_41 = arith.constant 0 : index
    %35 = vector.load %arg4[%c2_39, %c0_40, %c0_41] : memref<9x128x128xbf16, #tpu.memory_space<vmem>>, vector<1x128x128xbf16>
    %36 = vector.shape_cast %35 : vector<1x128x128xbf16> to vector<128x128xbf16>
    %cst_42 = arith.constant dense<0.000000e+00> : vector<64x128xf32>
    %37 = tpu.matmul %34, %36, %cst_42 {dimension_numbers = #tpu.dot_dimension_numbers<[1], [0], [0], [1], [0, 0, 1, 1], [], []>} : vector<64x128xbf16>, vector<128x128xbf16>, vector<64x128xf32> -> vector<64x128xf32>
    %38 = arith.addf %31, %37 : vector<64x128xf32>
    %c1_43 = arith.constant 1 : index
    %c0_44 = arith.constant 0 : index
    %c0_45 = arith.constant 0 : index
    %39 = vector.load %arg13[%c1_43, %c0_44, %c0_45] : memref<10x10x128xf32, #tpu.memory_space<vmem>>, vector<8x8x128xf32>
    %40 = vector.shape_cast %39 : vector<8x8x128xf32> to vector<64x128xf32>
    %41 = arith.truncf %40 : vector<64x128xf32> to vector<64x128xbf16>
    %c3 = arith.constant 3 : index
    %c0_46 = arith.constant 0 : index
    %c0_47 = arith.constant 0 : index
    %42 = vector.load %arg4[%c3, %c0_46, %c0_47] : memref<9x128x128xbf16, #tpu.memory_space<vmem>>, vector<1x128x128xbf16>
    %43 = vector.shape_cast %42 : vector<1x128x128xbf16> to vector<128x128xbf16>
    %cst_48 = arith.constant dense<0.000000e+00> : vector<64x128xf32>
    %44 = tpu.matmul %41, %43, %cst_48 {dimension_numbers = #tpu.dot_dimension_numbers<[1], [0], [0], [1], [0, 0, 1, 1], [], []>} : vector<64x128xbf16>, vector<128x128xbf16>, vector<64x128xf32> -> vector<64x128xf32>
    %45 = arith.addf %38, %44 : vector<64x128xf32>
    %c1_49 = arith.constant 1 : index
    %c1_50 = arith.constant 1 : index
    %c0_51 = arith.constant 0 : index
    %46 = vector.load %arg13[%c1_49, %c1_50, %c0_51] : memref<10x10x128xf32, #tpu.memory_space<vmem>>, vector<8x8x128xf32>
    %47 = vector.shape_cast %46 : vector<8x8x128xf32> to vector<64x128xf32>
    %48 = arith.truncf %47 : vector<64x128xf32> to vector<64x128xbf16>
    %c4 = arith.constant 4 : index
    %c0_52 = arith.constant 0 : index
    %c0_53 = arith.constant 0 : index
    %49 = vector.load %arg4[%c4, %c0_52, %c0_53] : memref<9x128x128xbf16, #tpu.memory_space<vmem>>, vector<1x128x128xbf16>
    %50 = vector.shape_cast %49 : vector<1x128x128xbf16> to vector<128x128xbf16>
    %cst_54 = arith.constant dense<0.000000e+00> : vector<64x128xf32>
    %51 = tpu.matmul %48, %50, %cst_54 {dimension_numbers = #tpu.dot_dimension_numbers<[1], [0], [0], [1], [0, 0, 1, 1], [], []>} : vector<64x128xbf16>, vector<128x128xbf16>, vector<64x128xf32> -> vector<64x128xf32>
    %52 = arith.addf %45, %51 : vector<64x128xf32>
    %c1_55 = arith.constant 1 : index
    %c2_56 = arith.constant 2 : index
    %c0_57 = arith.constant 0 : index
    %53 = vector.load %arg13[%c1_55, %c2_56, %c0_57] : memref<10x10x128xf32, #tpu.memory_space<vmem>>, vector<8x8x128xf32>
    %54 = vector.shape_cast %53 : vector<8x8x128xf32> to vector<64x128xf32>
    %55 = arith.truncf %54 : vector<64x128xf32> to vector<64x128xbf16>
    %c5 = arith.constant 5 : index
    %c0_58 = arith.constant 0 : index
    %c0_59 = arith.constant 0 : index
    %56 = vector.load %arg4[%c5, %c0_58, %c0_59] : memref<9x128x128xbf16, #tpu.memory_space<vmem>>, vector<1x128x128xbf16>
    %57 = vector.shape_cast %56 : vector<1x128x128xbf16> to vector<128x128xbf16>
    %cst_60 = arith.constant dense<0.000000e+00> : vector<64x128xf32>
    %58 = tpu.matmul %55, %57, %cst_60 {dimension_numbers = #tpu.dot_dimension_numbers<[1], [0], [0], [1], [0, 0, 1, 1], [], []>} : vector<64x128xbf16>, vector<128x128xbf16>, vector<64x128xf32> -> vector<64x128xf32>
    %59 = arith.addf %52, %58 : vector<64x128xf32>
    %c2_61 = arith.constant 2 : index
    %c0_62 = arith.constant 0 : index
    %c0_63 = arith.constant 0 : index
    %60 = vector.load %arg13[%c2_61, %c0_62, %c0_63] : memref<10x10x128xf32, #tpu.memory_space<vmem>>, vector<8x8x128xf32>
    %61 = vector.shape_cast %60 : vector<8x8x128xf32> to vector<64x128xf32>
    %62 = arith.truncf %61 : vector<64x128xf32> to vector<64x128xbf16>
    %c6 = arith.constant 6 : index
    %c0_64 = arith.constant 0 : index
    %c0_65 = arith.constant 0 : index
    %63 = vector.load %arg4[%c6, %c0_64, %c0_65] : memref<9x128x128xbf16, #tpu.memory_space<vmem>>, vector<1x128x128xbf16>
    %64 = vector.shape_cast %63 : vector<1x128x128xbf16> to vector<128x128xbf16>
    %cst_66 = arith.constant dense<0.000000e+00> : vector<64x128xf32>
    %65 = tpu.matmul %62, %64, %cst_66 {dimension_numbers = #tpu.dot_dimension_numbers<[1], [0], [0], [1], [0, 0, 1, 1], [], []>} : vector<64x128xbf16>, vector<128x128xbf16>, vector<64x128xf32> -> vector<64x128xf32>
    %66 = arith.addf %59, %65 : vector<64x128xf32>
    %c2_67 = arith.constant 2 : index
    %c1_68 = arith.constant 1 : index
    %c0_69 = arith.constant 0 : index
    %67 = vector.load %arg13[%c2_67, %c1_68, %c0_69] : memref<10x10x128xf32, #tpu.memory_space<vmem>>, vector<8x8x128xf32>
    %68 = vector.shape_cast %67 : vector<8x8x128xf32> to vector<64x128xf32>
    %69 = arith.truncf %68 : vector<64x128xf32> to vector<64x128xbf16>
    %c7 = arith.constant 7 : index
    %c0_70 = arith.constant 0 : index
    %c0_71 = arith.constant 0 : index
    %70 = vector.load %arg4[%c7, %c0_70, %c0_71] : memref<9x128x128xbf16, #tpu.memory_space<vmem>>, vector<1x128x128xbf16>
    %71 = vector.shape_cast %70 : vector<1x128x128xbf16> to vector<128x128xbf16>
    %cst_72 = arith.constant dense<0.000000e+00> : vector<64x128xf32>
    %72 = tpu.matmul %69, %71, %cst_72 {dimension_numbers = #tpu.dot_dimension_numbers<[1], [0], [0], [1], [0, 0, 1, 1], [], []>} : vector<64x128xbf16>, vector<128x128xbf16>, vector<64x128xf32> -> vector<64x128xf32>
    %73 = arith.addf %66, %72 : vector<64x128xf32>
    %c2_73 = arith.constant 2 : index
    %c2_74 = arith.constant 2 : index
    %c0_75 = arith.constant 0 : index
    %74 = vector.load %arg13[%c2_73, %c2_74, %c0_75] : memref<10x10x128xf32, #tpu.memory_space<vmem>>, vector<8x8x128xf32>
    %75 = vector.shape_cast %74 : vector<8x8x128xf32> to vector<64x128xf32>
    %76 = arith.truncf %75 : vector<64x128xf32> to vector<64x128xbf16>
    %c8 = arith.constant 8 : index
    %c0_76 = arith.constant 0 : index
    %c0_77 = arith.constant 0 : index
    %77 = vector.load %arg4[%c8, %c0_76, %c0_77] : memref<9x128x128xbf16, #tpu.memory_space<vmem>>, vector<1x128x128xbf16>
    %78 = vector.shape_cast %77 : vector<1x128x128xbf16> to vector<128x128xbf16>
    %cst_78 = arith.constant dense<0.000000e+00> : vector<64x128xf32>
    %79 = tpu.matmul %76, %78, %cst_78 {dimension_numbers = #tpu.dot_dimension_numbers<[1], [0], [0], [1], [0, 0, 1, 1], [], []>} : vector<64x128xbf16>, vector<128x128xbf16>, vector<64x128xf32> -> vector<64x128xf32>
    %80 = arith.addf %73, %79 : vector<64x128xf32>
    %c0_79 = arith.constant 0 : index
    %c0_80 = arith.constant 0 : index
    %81 = vector.load %arg5[%c0_79, %c0_80] : memref<1x128xf32, #tpu.memory_space<vmem>>, vector<1x128xf32>
    %82 = vector.broadcast %81 : vector<1x128xf32> to vector<64x128xf32>
    %83 = arith.addf %80, %82 : vector<64x128xf32>
    %cst_81 = arith.constant 0.000000e+00 : f32
    %84 = vector.broadcast %cst_81 : f32 to vector<64x128xf32>
    %85 = arith.maximumf %83, %84 : vector<64x128xf32>
    %cst_82 = arith.constant dense<0.000000e+00> : vector<128xf32>
    %86 = vector.multi_reduction <add>, %85, %cst_82 [0] : vector<64x128xf32> to vector<128xf32>
    %87 = vector.shape_cast %86 : vector<128xf32> to vector<1x128xf32>
    %cst_83 = arith.constant 1.562500e-02 : f32
    %88 = vector.broadcast %cst_83 : f32 to vector<1x128xf32>
    %89 = arith.mulf %87, %88 : vector<1x128xf32>
    %90 = arith.truncf %89 : vector<1x128xf32> to vector<1x128xbf16>
    %c0_84 = arith.constant 0 : index
    %c0_85 = arith.constant 0 : index
    %91 = vector.load %arg6[%c0_84, %c0_85] : memref<128x128xbf16, #tpu.memory_space<vmem>>, vector<128x128xbf16>
    %cst_86 = arith.constant dense<0.000000e+00> : vector<1x128xf32>
    %92 = tpu.matmul %90, %91, %cst_86 {dimension_numbers = #tpu.dot_dimension_numbers<[1], [0], [0], [1], [0, 0, 1, 1], [], []>} : vector<1x128xbf16>, vector<128x128xbf16>, vector<1x128xf32> -> vector<1x128xf32>
    %c0_87 = arith.constant 0 : index
    %c0_88 = arith.constant 0 : index
    %93 = vector.load %arg7[%c0_87, %c0_88] : memref<1x128xf32, #tpu.memory_space<vmem>>, vector<1x128xf32>
    %94 = arith.addf %92, %93 : vector<1x128xf32>
    %cst_89 = arith.constant 0.000000e+00 : f32
    %95 = vector.broadcast %cst_89 : f32 to vector<1x128xf32>
    %96 = arith.maximumf %94, %95 : vector<1x128xf32>
    %97 = arith.truncf %96 : vector<1x128xf32> to vector<1x128xbf16>
    %c0_90 = arith.constant 0 : index
    %c0_91 = arith.constant 0 : index
    %98 = vector.load %arg8[%c0_90, %c0_91] : memref<128x128xbf16, #tpu.memory_space<vmem>>, vector<128x128xbf16>
    %cst_92 = arith.constant dense<0.000000e+00> : vector<1x128xf32>
    %99 = tpu.matmul %97, %98, %cst_92 {dimension_numbers = #tpu.dot_dimension_numbers<[1], [0], [0], [1], [0, 0, 1, 1], [], []>} : vector<1x128xbf16>, vector<128x128xbf16>, vector<1x128xf32> -> vector<1x128xf32>
    %c0_93 = arith.constant 0 : index
    %c0_94 = arith.constant 0 : index
    %100 = vector.load %arg9[%c0_93, %c0_94] : memref<1x128xf32, #tpu.memory_space<vmem>>, vector<1x128xf32>
    %101 = arith.addf %99, %100 : vector<1x128xf32>
    %102 = arith.negf %101 : vector<1x128xf32>
    %103 = math.exp %102 : vector<1x128xf32>
    %cst_95 = arith.constant 1.000000e+00 : f32
    %104 = vector.broadcast %cst_95 : f32 to vector<1x128xf32>
    %105 = arith.addf %104, %103 : vector<1x128xf32>
    %106 = arith.divf %104, %105 : vector<1x128xf32>
    %107 = vector.broadcast %106 : vector<1x128xf32> to vector<64x128xf32>
    %108 = arith.mulf %85, %107 : vector<64x128xf32>
    %109 = arith.truncf %108 : vector<64x128xf32> to vector<64x128xbf16>
    %c0_96 = arith.constant 0 : index
    %c0_97 = arith.constant 0 : index
    %110 = vector.load %arg10[%c0_96, %c0_97] : memref<128x128xbf16, #tpu.memory_space<vmem>>, vector<128x128xbf16>
    %cst_98 = arith.constant dense<0.000000e+00> : vector<64x128xf32>
    %111 = tpu.matmul %109, %110, %cst_98 {dimension_numbers = #tpu.dot_dimension_numbers<[1], [0], [0], [1], [0, 0, 1, 1], [], []>} : vector<64x128xbf16>, vector<128x128xbf16>, vector<64x128xf32> -> vector<64x128xf32>
    %c0_99 = arith.constant 0 : index
    %c0_100 = arith.constant 0 : index
    %112 = vector.load %arg11[%c0_99, %c0_100] : memref<1x128xf32, #tpu.memory_space<vmem>>, vector<1x128xf32>
    %113 = vector.broadcast %112 : vector<1x128xf32> to vector<64x128xf32>
    %114 = arith.addf %111, %113 : vector<64x128xf32>
    %115 = arith.extf %1 : vector<64x128xbf16> to vector<64x128xf32>
    %116 = arith.addf %114, %115 : vector<64x128xf32>
    %cst_101 = arith.constant 0.000000e+00 : f32
    %117 = vector.broadcast %cst_101 : f32 to vector<64x128xf32>
    %118 = arith.maximumf %116, %117 : vector<64x128xf32>
    %119 = arith.truncf %118 : vector<64x128xf32> to vector<64x128xbf16>
    %c0_102 = arith.constant 0 : index
    %c0_103 = arith.constant 0 : index
    %c0_104 = arith.constant 0 : index
    %120 = vector.load %arg12[%c0_102, %c0_103, %c0_104] : memref<1x64x128xbf16, #tpu.memory_space<vmem>>, vector<1x64x128xbf16>
    %121 = vector.shape_cast %120 : vector<1x64x128xbf16> to vector<64x128xbf16>
    %122 = vector.shape_cast %119 : vector<64x128xbf16> to vector<1x64x128xbf16>
    tpu.vector_store %arg12[%c0_102, %c0_103, %c0_104], %122 {strides = array<i32>} : memref<1x64x128xbf16, #tpu.memory_space<vmem>>, vector<1x64x128xbf16>,
    return
  }
  func.func @transform_0(%arg0: i32) -> (i32, i32, i32) {
    %c0_i32 = arith.constant 0 : i32
    %c0_i32_0 = arith.constant 0 : i32
    %c0_i32_1 = arith.constant 0 : i32
    return %arg0, %c0_i32, %c0_i32_0 : i32, i32, i32
  }
  func.func @transform_1(%arg0: i32) -> (i32, i32) {
    %c0_i32 = arith.constant 0 : i32
    %c0_i32_0 = arith.constant 0 : i32
    %c0_i32_1 = arith.constant 0 : i32
    return %c0_i32, %c0_i32_0 : i32, i32
  }
  func.func @transform_2(%arg0: i32) -> (i32, i32) {
    %c0_i32 = arith.constant 0 : i32
    %c0_i32_0 = arith.constant 0 : i32
    %c0_i32_1 = arith.constant 0 : i32
    return %c0_i32, %c0_i32_0 : i32, i32
  }
  func.func @transform_3(%arg0: i32) -> (i32, i32, i32) {
    %c0_i32 = arith.constant 0 : i32
    %c0_i32_0 = arith.constant 0 : i32
    %c0_i32_1 = arith.constant 0 : i32
    %c0_i32_2 = arith.constant 0 : i32
    return %c0_i32, %c0_i32_0, %c0_i32_1 : i32, i32, i32
  }
  func.func @transform_4(%arg0: i32) -> (i32, i32) {
    %c0_i32 = arith.constant 0 : i32
    %c0_i32_0 = arith.constant 0 : i32
    %c0_i32_1 = arith.constant 0 : i32
    return %c0_i32, %c0_i32_0 : i32, i32
  }
  func.func @transform_5(%arg0: i32) -> (i32, i32) {
    %c0_i32 = arith.constant 0 : i32
    %c0_i32_0 = arith.constant 0 : i32
    %c0_i32_1 = arith.constant 0 : i32
    return %c0_i32, %c0_i32_0 : i32, i32
  }
  func.func @transform_6(%arg0: i32) -> (i32, i32) {
    %c0_i32 = arith.constant 0 : i32
    %c0_i32_0 = arith.constant 0 : i32
    %c0_i32_1 = arith.constant 0 : i32
    return %c0_i32, %c0_i32_0 : i32, i32
  }
  func.func @transform_7(%arg0: i32) -> (i32, i32) {
    %c0_i32 = arith.constant 0 : i32
    %c0_i32_0 = arith.constant 0 : i32
    %c0_i32_1 = arith.constant 0 : i32
    return %c0_i32, %c0_i32_0 : i32, i32
  }
  func.func @transform_8(%arg0: i32) -> (i32, i32) {
    %c0_i32 = arith.constant 0 : i32
    %c0_i32_0 = arith.constant 0 : i32
    %c0_i32_1 = arith.constant 0 : i32
    return %c0_i32, %c0_i32_0 : i32, i32
  }
  func.func @transform_9(%arg0: i32) -> (i32, i32) {
    %c0_i32 = arith.constant 0 : i32
    %c0_i32_0 = arith.constant 0 : i32
    %c0_i32_1 = arith.constant 0 : i32
    return %c0_i32, %c0_i32_0 : i32, i32
  }
  func.func @transform_10(%arg0: i32) -> (i32, i32) {
    %c0_i32 = arith.constant 0 : i32
    %c0_i32_0 = arith.constant 0 : i32
    %c0_i32_1 = arith.constant 0 : i32
    return %c0_i32, %c0_i32_0 : i32, i32
  }
  func.func @transform_11(%arg0: i32) -> (i32, i32, i32) {
    %c0_i32 = arith.constant 0 : i32
    %c0_i32_0 = arith.constant 0 : i32
    %c0_i32_1 = arith.constant 0 : i32
    return %arg0, %c0_i32, %c0_i32_0 : i32, i32, i32
  }
}

</mosaic_0001>

<bundles_post_ra>
// kernel: tpu_custom_call.1
= control target key start
LH: loop header
LB: loop body
LE: loop exit
PB: predicated region body
PF: predicated region fallthrough
CT: control target
= control target key end

     0   :  { %s4450_s0 = inlined_call_operand.hbm [shape: bf16[2,64,128], index: 0, kind: input, shape index: {}]   ;;  %s4451_s1 = inlined_call_operand.hbm [shape: bf16[128,128], index: 1, kind: input, shape index: {}]   ;;  %s4452_s2 = inlined_call_operand.vmem [shape: f32[1,128], index: 2, kind: input, shape index: {}]   ;;  %s4453_s3 = inlined_call_operand.hbm [shape: bf16[9,128,128], index: 3, kind: input, shape index: {}]   ;;  %s4454_s4 = inlined_call_operand.vmem [shape: f32[1,128], index: 4, kind: input, shape index: {}]   ;;  %s4455_s5 = inlined_call_operand.hbm [shape: bf16[128,128], index: 5, kind: input, shape index: {}]   ;;  %s4456_s6 = inlined_call_operand.vmem [shape: f32[1,128], index: 6, kind: input, shape index: {}]   ;;  %s4457_s7 = inlined_call_operand.hbm [shape: bf16[128,128], index: 7, kind: input, shape index: {}]   ;;  %s4458_s8 = inlined_call_operand.vmem [shape: f32[1,128], index: 8, kind: input, shape index: {}]   ;;  %s4459_s9 = inlined_call_operand.hbm [shape: bf16[128,128], index: 9, kind: input, shape index: {}]   ;;  %s4460_s10 = inlined_call_operand.vmem [shape: f32[1,128], index: 10, kind: input, shape index: {}]   ;;  %s4461_s11 = inlined_call_operand.hbm [shape: bf16[2,64,128], index: 11, kind: output, shape index: {}]  }
   0x1   :  { %4467 = sst [smem:[#allocation20_spill]] %s4451_s1 }
   0x2   :  { %4468 = sst [smem:[#allocation21_spill]] %s4458_s8 }
   0x3   :  { %4469 = sst [smem:[#allocation22_spill]] %s4460_s10 }
   0x4   :  { %4470 = sst [smem:[#allocation23_spill]] %s4461_s11 }
   0x5   :  { %16 = vsyncpa [#allocation4], 0 }
   0x6   :  { %18 = vsyncpa [#allocation4 + $0x1], 0 }
   0x7   :  { %19 = vsyncpa [#allocation7], 0 }
   0x8   :  { %20 = vsyncpa [#allocation10], 0 }
   0x9   :  { %21 = vsyncpa [#allocation13], 0 }
   0xa   :  { %22 = vsyncpa [#allocation5], 0 }
   0xb   :  { %24 = vsyncpa [#allocation5 + $0x1], 0  ;;  %s3867_s17 = smov 0   ;;  %s3869_s18 = smov 0  }
   0xc   :  { %s3871_s19 = smov 0   ;;  %s3873_s20 = smov 0  }
   0xd LB: > { %s3794_s21 = smov [#allocation6]   ;;  %s3888_s23 = sadd.s32 4294967295, %s3792_s20   ;;  %s3792_s20 = sphi %s3873_s20, %s4497_s20   ;;  %s3788_s19 = sphi %s3871_s19, %s4496_s19   ;;  %s3784_s18 = sphi %s3869_s18, %s4495_s18   ;;  %s3780_s17 = sphi %s3867_s17, %s4494_s17  }
   0xe   : > { %s309_s22 = sshll.u32 %s3794_s21, 4  ;;  %p2627_p0 = scmp.ge.s32.totalorder %s3792_s20, 1  ;;  %s3893_s22 = int_to_ptr.vmem [resolvable:$true] %s309_s22 }
   0xf   : > { %p4463_p1 = scmp.eq.s32.totalorder %s3888_s23, 0  ;;  %p297_p2 = scmp.lt.s32.totalorder %s3792_s20, 3 }
  0x10   : > { %s3795_s25 = smov [#allocation9]   ;;  %s3796_s28 = smov [#allocation8]  }
  0x11   : > { %p3895_p3 = pnand %p2627_p0, %p297_p2  ;;  %s341_s26 = sshll.u32 %s3795_s25, 4  ;;  %s3908_s26 = int_to_ptr.vmem [resolvable:$true] %s341_s26 }
  0x12   : > { %s325_s29 = sshll.u32 %s3796_s28, 4  ;;  %s4473_s1 = sld [smem:[#allocation20_spill]]  ;;  %s3910_s29 = int_to_ptr.vmem [resolvable:$true] %s325_s29 }
  0x13   : > { %s4471_s24 = scalar_select %p3895_p3, 1, 0 }
  0x14   : > { %p3345_p5 = pneg %p3895_p3 }
  0x16   : > { %p3904_p6 = pnand %p3345_p5, %p4463_p1 }
  0x18   : > { %s3544_s13 = scalar_lea.hbm %s4473_s1, 1024  ;;  %p3920_p8 = pneg %p3904_p6 }
  0x19   : > { %p3545_p7 = scmp.ne.s32.totalorder %s4473_s1, %s3544_s13  ;;  %p3551_p11 = scmp.lt.u32.totalorder %s3544_s13, %s4473_s1 }
  0x1b   : > { %p3547_p9 = pnand %p3920_p8, %p3545_p7 }
  0x1d   : > { %p3548_p10 = pneg %p3547_p9 }
  0x1f   : > { %p3553_p12 = pnand %p3551_p11, %p3548_p10 }
  0x21   : > { %3556 = shalt.err (!%p3553_p12)
}
  0x22   : > { %s3557_s28 = scalar_lea.vmem %s3893_s22, 1024  ;;  %p3565_p5 = scmp.lt.s32.totalorder %s3893_s22, %s3893_s22 }
  0x23   : > { %p3558_p13 = scmp.ne.s32.totalorder %s3893_s22, %s3557_s28  ;;  %p3566_p4 = scmp.lt.s32.totalorder %s3557_s28, %s3557_s28 }
  0x25   : > { %p3560_p0 = pnand %p3558_p13, %p3920_p8  ;;  %p3567_p7 = por %p3566_p4, %p3565_p5 }
  0x27   : > { %p3561_p2 = pneg %p3560_p0 }
  0x29   : > { %p3568_p9 = pnand %p3567_p7, %p3561_p2 }
  0x2b   : > { %3571 = shalt.err (!%p3568_p9)
}
  0x2c   : > { %s4465_s30 = smov 64   ;;  %s3798_s12 = smov 4  }
  0x2d   : > { %3348 = dma.hbm_to_vmem [thread:$0]  (!%p3904_p6), %s4473_s1, 1024, %s3893_s22, [#allocation7], %s4465_s30, %s4465_s30, %s3798_s12  }
  0x2e   : > { %s3572_s25 = scalar_lea.hbm %s4455_s5, 1024 }
  0x2f   : > { %p3573_p4 = scmp.ne.s32.totalorder %s4455_s5, %s3572_s25  ;;  %p3579_p12 = scmp.lt.u32.totalorder %s3572_s25, %s4455_s5 }
  0x31   : > { %p3575_p10 = pnand %p3573_p4, %p3920_p8 }
  0x33   : > { %p3576_p11 = pneg %p3575_p10 }
  0x35   : > { %p3581_p13 = pnand %p3579_p12, %p3576_p11 }
  0x37   : > { %3584 = shalt.err (!%p3581_p13)
}
  0x38   : > { %s3585_s22 = scalar_lea.vmem %s3908_s26, 1024  ;;  %p3593_p7 = scmp.lt.s32.totalorder %s3908_s26, %s3908_s26 }
  0x39   : > { %p3586_p0 = scmp.ne.s32.totalorder %s3908_s26, %s3585_s22  ;;  %p3594_p9 = scmp.lt.s32.totalorder %s3585_s22, %s3585_s22 }
  0x3b   : > { %p3588_p2 = pnand %p3586_p0, %p3920_p8  ;;  %p3595_p4 = por %p3594_p9, %p3593_p7 }
  0x3d   : > { %p3589_p5 = pneg %p3588_p2 }
  0x3f   : > { %p3596_p10 = pnand %p3595_p4, %p3589_p5 }
  0x41   : > { %3599 = shalt.err (!%p3596_p10)
}
  0x42   : > { %3354 = dma.hbm_to_vmem [thread:$0]  (!%p3904_p6), %s4455_s5, 1024, %s3908_s26, [#allocation10], %s4465_s30, %s4465_s30, %s3798_s12  }
  0x43   : > { %s3600_s14 = scalar_lea.hbm %s4453_s3, 9216 }
  0x44   : > { %p3601_p11 = scmp.ne.s32.totalorder %s4453_s3, %s3600_s14  ;;  %p3607_p0 = scmp.lt.u32.totalorder %s3600_s14, %s4453_s3 }
  0x46   : > { %p3603_p12 = pnand %p3601_p11, %p3920_p8 }
  0x48   : > { %p3604_p13 = pneg %p3603_p12 }
  0x4a   : > { %p3609_p2 = pnand %p3607_p0, %p3604_p13 }
  0x4c   : > { %3612 = shalt.err (!%p3609_p2)
}
  0x4d   : > { %s3613_s26 = scalar_lea.vmem %s3910_s29, 9216  ;;  %p3621_p4 = scmp.lt.s32.totalorder %s3910_s29, %s3910_s29 }
  0x4e   : > { %p3614_p5 = scmp.ne.s32.totalorder %s3910_s29, %s3613_s26  ;;  %p3622_p10 = scmp.lt.s32.totalorder %s3613_s26, %s3613_s26 }
  0x50   : > { %p3616_p7 = pnand %p3614_p5, %p3920_p8  ;;  %p3623_p11 = por %p3622_p10, %p3621_p4 }
  0x52   : > { %p3617_p9 = pneg %p3616_p7 }
  0x54   : > { %p3624_p12 = pnand %p3623_p11, %p3617_p9 }
  0x56   : > { %3627 = shalt.err (!%p3624_p12)
}
  0x57   : > { %3351 = dma.hbm_to_vmem [thread:$0]  (!%p3904_p6), %s4453_s3, 9216, %s3910_s29, [#allocation7], %s4465_s30, %s4465_s30, %s3798_s12  }
  0x58   : > { %s3799_s10 = smov [#allocation11]   ;;  %s3800_s13 = smov [#allocation12]  }
  0x59   : > { %s357_s11 = sshll.u32 %s3799_s10, 4  ;;  %s373_s14 = sshll.u32 %s3800_s13, 4  ;;  %s358_s11 = int_to_ptr.vmem [resolvable:$true] %s357_s11  ;;  %s374_s14 = int_to_ptr.vmem [resolvable:$true] %s373_s14 }
  0x5a   : > { %s3628_s25 = scalar_lea.hbm %s4457_s7, 1024 }
  0x5b   : > { %p3629_p13 = scmp.ne.s32.totalorder %s4457_s7, %s3628_s25  ;;  %p3635_p5 = scmp.lt.u32.totalorder %s3628_s25, %s4457_s7 }
  0x5d   : > { %p3631_p0 = pnand %p3629_p13, %p3920_p8 }
  0x5f   : > { %p3632_p2 = pneg %p3631_p0 }
  0x61   : > { %p3637_p7 = pnand %p3635_p5, %p3632_p2 }
  0x63   : > { %3640 = shalt.err (!%p3637_p7)
}
  0x64   : > { %s3641_s29 = scalar_lea.vmem %s358_s11, 1024  ;;  %p3649_p11 = scmp.lt.s32.totalorder %s358_s11, %s358_s11 }
  0x65   : > { %p3642_p9 = scmp.ne.s32.totalorder %s358_s11, %s3641_s29  ;;  %p3650_p12 = scmp.lt.s32.totalorder %s3641_s29, %s3641_s29 }
  0x67   : > { %p3644_p4 = pnand %p3642_p9, %p3920_p8  ;;  %p3651_p1 = por %p3650_p12, %p3649_p11 }
  0x69   : > { %p3645_p10 = pneg %p3644_p4 }
  0x6b   : > { %p3652_p3 = pnand %p3651_p1, %p3645_p10 }
  0x6d   : > { %3655 = shalt.err (!%p3652_p3)
}
  0x6e   : > { %3357 = dma.hbm_to_vmem [thread:$0]  (!%p3904_p6), %s4457_s7, 1024, %s358_s11, [#allocation10], %s4465_s30, %s4465_s30, %s3798_s12  }
  0x6f   : > { %s3656_s15 = scalar_lea.hbm %s4459_s9, 1024 }
  0x70   : > { %p3657_p1 = scmp.ne.s32.totalorder %s4459_s9, %s3656_s15  ;;  %p3663_p0 = scmp.lt.u32.totalorder %s3656_s15, %s4459_s9 }
  0x72   : > { %p3659_p3 = pnand %p3657_p1, %p3920_p8 }
  0x74   : > { %p3660_p13 = pneg %p3659_p3 }
  0x76   : > { %p3665_p2 = pnand %p3663_p0, %p3660_p13 }
  0x78   : > { %3668 = shalt.err (!%p3665_p2)
}
  0x79   : > { %s3669_s22 = scalar_lea.vmem %s374_s14, 1024  ;;  %p3677_p4 = scmp.lt.s32.totalorder %s374_s14, %s374_s14 }
  0x7a   : > { %p3670_p5 = scmp.ne.s32.totalorder %s374_s14, %s3669_s22  ;;  %p3678_p10 = scmp.lt.s32.totalorder %s3669_s22, %s3669_s22 }
  0x7c   : > { %p3672_p7 = pnand %p3670_p5, %p3920_p8  ;;  %p3679_p11 = por %p3678_p10, %p3677_p4 }
  0x7e   : > { %p3673_p9 = pneg %p3672_p7 }
  0x80   : > { %p3680_p12 = pnand %p3679_p11, %p3673_p9 }
  0x82   : > { %3683 = shalt.err (!%p3680_p12)
}
  0x83   : > { %3360 = dma.hbm_to_vmem [thread:$0]  (!%p3904_p6), %s4459_s9, 1024, %s374_s14, [#allocation13], %s4465_s30, %s4465_s30, %s3798_s12  }
  0x84   : > { %s2626_s27 = sadd.s32 4294967294, %s3792_s20   ;;  %s4040_s16 = sadd.s32 1, %s3792_s20  }
  0x85   : > { %s37_s1 = sadd.s32 1, %s3788_s19  ;;  %s34_s8 = ssub.s32 %s3792_s20, %s4040_s16 }
  0x86   : > { %p44_p8 = scmp.ne.s32.totalorder %s3788_s19, %s3784_s18  ;;  %p35_p1 = scmp.eq.s32.totalorder %s34_s8, 0 }
  0x87   : > { %p45_p3 = scmp.eq.s32.totalorder %s3792_s20, 0  ;;  %p50_p13 = scmp.ne.s32.totalorder %s3784_s18, %s3780_s17 }
  0x88   : > { %p284_p0 = scmp.eq.s32.totalorder %s3888_s23, 1  ;;  %p4475_p5 = scmp.eq.s32.totalorder %s3888_s23, 0 }
  0x89   : > { %s4052_s10 = scalar_select %p35_p1, %s3788_s19, %s37_s1  }
  0x8a   : > { %p46_p2 = por %p45_p3, %p44_p8  ;;  %p4056_p7 = por %p4475_p5, %p50_p13 }
  0x8b   : > { %p4060_p6 = por %p284_p0, %p44_p8  ;;  %p290_p9 = scmp.eq.s32.totalorder %s2626_s27, 1 }
  0x8c   : > { %p3374_p4 = scmp.lt.s32.totalorder %s3792_s20, 2  ;;  %s390_s15 = sand.u32 1, %s3788_s19  }
  0x8d   : > { %s4477_s14 = scalar_select %p4060_p6, 1, 0 }
  0x8e   : > { %p4066_p10 = por %p290_p9, %p50_p13  ;;  %s2634_s25 = sshll.u32 %s390_s15, 5 }
  0x8f   : > { %s2770_s28 = sshll.u32 %s3792_s20, 9  ;;  %s394_s29 = scalar_lea.vmem [#allocation3], %s2634_s25 }
  0x90   : > { %s4478_s21 = scalar_select %p4066_p10, 1, 0 }
  0x91   : > { %s4074_s11 = scalar_lea.hbm %s4450_s0, %s2770_s28  ;;  %s401_s1 = sshll.u32 %s394_s29, 4  ;;  %s4080_s1 = int_to_ptr.vmem [resolvable:$true] %s401_s1 }
  0x92   : > { %p4076_p11 = pnand %p3374_p4, %p46_p2  ;;  %s4082_s8 = scalar_lea.sflag [#allocation4], %s390_s15 }
  0x93   : > { %s3684_s30 = scalar_lea.hbm %s4074_s11, 512  ;;  %s3689_s26 = scalar_lea.hbm %s4450_s0, 1024 }
  0x94   : > { %p3685_p12 = scmp.ne.s32.totalorder %s4074_s11, %s3684_s30  ;;  %p3686_p8 = pneg %p4076_p11 }
  0x95   : > { %p3690_p13 = scmp.lt.u32.totalorder %s4074_s11, %s4450_s0  ;;  %p3691_p0 = scmp.lt.u32.totalorder %s3689_s26, %s3684_s30 }
  0x96   : > { %p3687_p1 = pnand %p3686_p8, %p3685_p12  ;;  %p3693_p5 = scmp.lt.u32.totalorder %s3684_s30, %s4074_s11 }
  0x97   : > { %p3692_p2 = por %p3691_p0, %p3690_p13 }
  0x98   : > { %p3688_p3 = pneg %p3687_p1 }
  0x99   : > { %p3694_p9 = por %p3693_p5, %p3692_p2 }
  0x9b   : > { %p3695_p4 = pnand %p3694_p9, %p3688_p3 }
  0x9d   : > { %3698 = shalt.err (!%p3695_p4)
}
  0x9e   : > { %s3699_s15 = scalar_lea.vmem %s4080_s1, 512  ;;  %s3801_s25 = smov [#allocation3]  }
  0x9f   : > { %p3700_p12 = scmp.ne.s32.totalorder %s4080_s1, %s3699_s15  ;;  %s3704_s28 = sshll.u32 %s3801_s25, 4  ;;  %s3705_s28 = int_to_ptr.vmem [resolvable:$false] %s3704_s28 }
  0xa0   : > { %s3706_s22 = scalar_lea.vmem %s3705_s28, 1024  ;;  %p3707_p6 = scmp.lt.s32.totalorder %s4080_s1, %s3705_s28 }
  0xa1   : > { %p3702_p1 = pnand %p3700_p12, %p3686_p8  ;;  %p3708_p13 = scmp.lt.s32.totalorder %s3706_s22, %s3699_s15 }
  0xa3   : > { %p3703_p10 = pneg %p3702_p1  ;;  %p3709_p0 = por %p3708_p13, %p3707_p6 }
  0xa5   : > { %p3710_p2 = pnand %p3709_p0, %p3703_p10 }
  0xa7   : > { %3713 = shalt.err (!%p3710_p2)
}
  0xa8   : > { %s4480_s30 = smov 64   ;;  %p4481_p8 = scmp.ne.s32.totalorder %s4471_s24, 0 }
  0xa9   : > { %3364 = dma.hbm_to_vmem [thread:$0]  (!%p4076_p11), %s4074_s11, 512, %s4080_s1, %s4082_s8, %s4480_s30, %s4480_s30, %s3798_s12  }
  0xaa   : > { %413 = sbr.rel (%p4481_p8) target bundleno = 1604 (0x644), region = 64  ;;  %s4116_s26 = sand.u32 (!%p4481_p8), 1, %s3784_s18  }
  0xab   : > { %s2638_s29 = sshll.u32 (!%p4481_p8), %s4116_s26, 5  ;;  %s416_s15 = scalar_lea.sflag (!%p4481_p8), [#allocation4], %s4116_s26 }
  0xac   : > { %s4122_s27 = scalar_lea.vmem (!%p4481_p8), [#allocation3], %s2638_s29 }
  0xb1   : > { %3759 = dma.done.wait (%p4056_p7), %s416_s15, 512  }
  0xb2   : > { %3761 = vsyncadd (%p4056_p7), %s416_s15, 4294966784  ;;  %p4482_p6 = scmp.eq.s32.totalorder %s3888_s23, 0 }
  0xb4   : > { %3763 = dma.done.wait (%p4482_p6), [#allocation7], 10240   ;;  %p4483_p10 = pmov %p4482_p6 }
  0xb5   : > { %p4484_p11 = pmov %p4482_p6 }
  0xb6   : > { %3765 = vsyncadd (%p4483_p10), [#allocation7], 4294957056 }
  0xb7   : > { %3767 = dma.done.wait (%p4484_p11), [#allocation10], 2048   ;;  %p4485_p3 = pmov %p4482_p6 }
  0xb9   : > { %3769 = vsyncadd (%p4485_p3), [#allocation10], 4294965248  ;;  %p4486_p5 = pmov %p4485_p3 }
  0xba   : > { %p4487_p9 = pmov %p4485_p3 }
  0xbb   : > { %3771 = dma.done.wait (%p4486_p5), [#allocation13], 1024  }
  0xbc   : > { %3773 = vsyncadd (%p4487_p9), [#allocation13], 4294966272  ;;  %v3424_v0 = vld [vmem:[#allocation6] sm:$0xff]   ;;  %v3425_v1 = vld [vmem:[#allocation6 + $0x8] sm:$0xff]   ;;  %v3802_v22 = vmov 0.0   ;;  %vm3803_vm0 = vmmov 0  }
  0xbd   : > { %2953 = vmatprep.subr.bf16.mxu0 %v3424_v0  ;;  %v3426_v2 = vld [vmem:[#allocation6 + $0x10] sm:$0xff]   ;;  %v3427_v3 = vld [vmem:[#allocation6 + $0x18] sm:$0xff]   ;;  %v479_v4 = vld [vmem:[%s4122_s27] sm:$0xff]   ;;  %655 = vst [vmem:[#allocation2] sm:$0xff] %v3802_v22  ;;  %s4488_s22 = sld [smem:[#allocation21_spill]]  ;;  %s4489_s24 = sld [smem:[#allocation22_spill]] }
  0xbe   : > { %2954 = vmatpush3.bf16.msra.mxu0 %v3424_v0  ;;  %2969 = vmatprep.mubr.bf16.mxu0 %v479_v4  ;;  %v3437_v5 = vld [vmem:[#allocation8 + $0x80] sm:$0xff]   ;;  %v3439_v7 = vld [vmem:[#allocation8 + $0x88] sm:$0xff]   ;;  %v3441_v8 = vld [vmem:[#allocation8 + $0x90] sm:$0xff]   ;;  %656 = vst [vmem:[#allocation2 + $0x8] sm:$0x3] %v3802_v22  ;;  %s477_s12 = scalar_lea.vmem [#allocation14], %s2638_s29 }
  0xbf   : > { %2955 = vmatprep.subr.bf16.mxu0 %v3425_v1  ;;  %v3428_v6 = vld [vmem:[#allocation6 + $0x20] sm:$0xff]   ;;  %3025 = vmatprep.subr.bf16.mxu1 %v3437_v5  ;;  %v3429_v9 = vld [vmem:[#allocation6 + $0x28] sm:$0xff]   ;;  %v3443_v10 = vld [vmem:[#allocation8 + $0x98] sm:$0xff]   ;;  %658 = vst [vmem:[#allocation2 + $0x90] sm:$0xff] %v3802_v22  ;;  %s2779_s13 = sshll.u32 %s3888_s23, 9  ;;  %s4490_s1 = sld [smem:[#allocation23_spill]] }
  0xc0   : > { %3026 = vmatpush3.bf16.msra.mxu1 %v3437_v5  ;;  %v3430_v11 = vld [vmem:[#allocation6 + $0x30] sm:$0xff]   ;;  %v3431_v12 = vld [vmem:[#allocation6 + $0x38] sm:$0xff]   ;;  %v481_v13 = vld [vmem:[%s4122_s27 + $0x8] sm:$0xff]   ;;  %659 = vst [vmem:[#allocation2 + $0x98] sm:$0x3] %v3802_v22  ;;  %s2492_s25 = scalar_lea.sflag [#allocation5], %s4116_s26 }
  0xc1   : > { %3027 = vmatprep.subr.bf16.mxu1 %v3439_v7  ;;  %v483_v14 = vld [vmem:[%s4122_s27 + $0x10] sm:$0xff]   ;;  %v3436_v15 = vld [vmem:[#allocation8 + $0x40] sm:$0xff]   ;;  %v3438_v16 = vld [vmem:[#allocation8 + $0x48] sm:$0xff]   ;;  %661 = vst [vmem:[#allocation2 + $0x10] sm:$0x1] %v3802_v22  ;;  %p4491_p4 = scmp.ne.s32.totalorder %s4477_s14, 0 }
  0xc2   : > { %2956 = vmatpush3.bf16.msra.mxu0 %v3425_v1  ;;  %v485_v17 = vld [vmem:[%s4122_s27 + $0x18] sm:$0xff]   ;;  %v3440_v18 = vld [vmem:[#allocation8 + $0x50] sm:$0xff]   ;;  %v3444_v20 = vld [vmem:[#allocation8 + $0x60] sm:$0xff]   ;;  %662 = vst [vmem:[#allocation2 + $0x20] sm:$0x1] %v3802_v22  ;;  %s3804_s28 = smov [#allocation14]  }
  0xc3   : > { %2957 = vmatprep.subr.bf16.mxu0 %v3426_v2  ;;  %v3442_v19 = vld [vmem:[#allocation8 + $0x58] sm:$0xff]   ;;  %v3446_v21 = vld [vmem:[#allocation8 + $0x68] sm:$0xff]   ;;  %663 = vst [vmem:[#allocation2 + $0x30] sm:$0x1] %v3802_v22  ;;  %664 = vst [vmem:[#allocation2 + $0x40] sm:$0x1] %v3802_v22 }
  0xc4   : > { %3028 = vmatpush3.bf16.msra.mxu1 %v3439_v7  ;;  %665 = vst [vmem:[#allocation2 + $0x50] sm:$0x1] %v3802_v22  ;;  %666 = vst [vmem:[#allocation2 + $0x60] sm:$0x1] %v3802_v22  ;;  %v3445_v23 = vld [vmem:[#allocation8 + $0xa0] sm:$0xff]   ;;  %v3448_v24 = vld [vmem:[#allocation8 + $0x70] sm:$0xff]  }
  0xc5   : > { %3029 = vmatprep.subr.bf16.mxu1 %v3441_v8  ;;  %667 = vst [vmem:[#allocation2 + $0x70] sm:$0x1] %v3802_v22  ;;  %668 = vst [vmem:[#allocation2 + $0x80] sm:$0x1] %v3802_v22  ;;  %v3447_v25 = vld [vmem:[#allocation8 + $0xa8] sm:$0xff]   ;;  %v3450_v26 = vld [vmem:[#allocation8 + $0x78] sm:$0xff]   ;;  %s4406_s8 = scalar_lea.hbm %s4490_s1, %s2779_s13 }
  0xc6   : > { %2958 = vmatpush3.bf16.msra.mxu0 %v3426_v2  ;;  %669 = vst [vmem:[#allocation2 + $0x19] sm:$0x1] %v3802_v22  ;;  %670 = vst [vmem:[#allocation2 + $0x29] sm:$0x1] %v3802_v22  ;;  %v3449_v27 = vld [vmem:[#allocation8 + $0xb0] sm:$0xff]   ;;  %v3452_v28 = vld [vmem:[#allocation8] sm:$0xff]  }
  0xc7   : > { %2959 = vmatprep.subr.bf16.mxu0 %v3427_v3  ;;  %671 = vst [vmem:[#allocation2 + $0x39] sm:$0x1] %v3802_v22  ;;  %672 = vst [vmem:[#allocation2 + $0x49] sm:$0x1] %v3802_v22  ;;  %v3451_v29 = vld [vmem:[#allocation8 + $0xb8] sm:$0xff]   ;;  %v4164_v30 = vld [vmem:[#allocation8 + $0xc0] sm:$0xff]  }
  0xc8   : > { %3030 = vmatpush3.bf16.msra.mxu1 %v3441_v8  ;;  %673 = vst [vmem:[#allocation2 + $0x59] sm:$0x1] %v3802_v22  ;;  %674 = vst [vmem:[#allocation2 + $0x69] sm:$0x1] %v3802_v22  ;;  %v2645_v31 = vld [vmem:[%s4452_s2] ss:$0 sm:$0xff] }
  0xc9   : > { %3031 = vmatprep.subr.bf16.mxu1 %v3443_v10  ;;  %675 = vst [vmem:[#allocation2 + $0x79] sm:$0x1] %v3802_v22  ;;  %676 = vst [vmem:[#allocation2 + $0x89] sm:$0x1] %v3802_v22  ;;  %v713_v40 = vld [vmem:[#allocation2 + $0x1] sm:$0xff]  ;;  %v3456_v63 = vld [vmem:[#allocation8 + $0x10] sm:$0xff]  }
  0xca   : > { %2960 = vmatpush3.bf16.msra.mxu0 %v3427_v3  ;;  %v3454_v49 = vld [vmem:[#allocation8 + $0x8] sm:$0xff]  }
  0xcb   : > { %2961 = vmatprep.subr.bf16.mxu0 %v3428_v6  ;;  %v968_v58 = vld [vmem:[#allocation2 + $0x2] sm:$0xff] }
  0xcc   : > { %3032 = vmatpush3.bf16.msra.mxu1 %v3443_v10  ;;  %v3455_v10 = vld [vmem:[#allocation8 + $0xc8] sm:$0xff]  }
  0xcd   : > { %3033 = vmatprep.subr.bf16.mxu1 %v3445_v23 }
  0xce   : > { %2962 = vmatpush3.bf16.msra.mxu0 %v3428_v6 }
  0xcf   : > { %2963 = vmatprep.subr.bf16.mxu0 %v3429_v9 }
  0xd0   : > { %3034 = vmatpush3.bf16.msra.mxu1 %v3445_v23 }
  0xd1   : > { %3035 = vmatprep.subr.bf16.mxu1 %v3447_v25 }
  0xd2   : > { %2964 = vmatpush3.bf16.msra.mxu0 %v3429_v9 }
  0xd3   : > { %2965 = vmatprep.subr.bf16.mxu0 %v3430_v11 }
  0xd4   : > { %3036 = vmatpush3.bf16.msra.mxu1 %v3447_v25  ;;  %v3459_v25 = vld [vmem:[#allocation8 + $0xd8] sm:$0xff]  }
  0xd5   : > { %3037 = vmatprep.subr.bf16.mxu1 %v3449_v27 }
  0xd6   : > { %2966 = vmatpush3.bf16.msra.mxu0 %v3430_v11 }
  0xd7   : > { %2967 = vmatprep.subr.bf16.mxu0 %v3431_v12 }
  0xd8   : > { %3038 = vmatpush3.bf16.msra.mxu1 %v3449_v27  ;;  %v3462_v27 = vld [vmem:[#allocation8 + $0x28] sm:$0xff]  }
  0xd9   : > { %3039 = vmatprep.subr.bf16.mxu1 %v3451_v29 }
  0xda   : > { %2968 = vmatpush3.bf16.msra.mxu0 %v3431_v12  ;;  %v3458_v12 = vld [vmem:[#allocation8 + $0x18] sm:$0xff]  }
  0xdb   : > { %2977 = vmatprep.subr.bf16.mxu0 %v3436_v15 }
  0xdc   : > { %3040 = vmatpush3.bf16.msra.mxu1 %v3451_v29  ;;  %v3461_v29 = vld [vmem:[#allocation8 + $0xe0] sm:$0xff]  }
  0xdd   : > { %2970 = vmatmul.mubr.bf16.vlgmr.msra.gmra.mrb[0].mxu0 %v481_v13  ;;  %3049 = vmatprep.subr.bf16.mxu1 %v4164_v30 }
  0xde   : > { %2973 = vmatprep.mubr.bf16.mxu0 %v483_v14  ;;  %2978 = vmatpush3.bf16.msra.mxu0 %v3436_v15 }
  0xdf   : > { %2979 = vmatprep.subr.bf16.mxu0 %v3438_v16 }
  0xe2   : > { %2980 = vmatpush3.bf16.msra.mxu0 %v3438_v16  ;;  %v3457_v16 = vld [vmem:[#allocation8 + $0xd0] sm:$0xff]  }
  0xe3   : > { %2981 = vmatprep.subr.bf16.mxu0 %v3440_v18 }
  0xe5   : > { %2974 = vmatmul.mubr.bf16.gmra.mrb[4].mxu0 %v485_v17 }
  0xe6   : > { %2982 = vmatpush3.bf16.msra.mxu0 %v3440_v18 }
  0xe7   : > { %2983 = vmatprep.subr.bf16.mxu0 %v3442_v19 }
  0xea   : > { %2984 = vmatpush3.bf16.msra.mxu0 %v3442_v19  ;;  %v3460_v19 = vld [vmem:[#allocation8 + $0x20] sm:$0xff]  }
  0xeb   : > { %2985 = vmatprep.subr.bf16.mxu0 %v3444_v20 }
  0xee   : > { %2986 = vmatpush3.bf16.msra.mxu0 %v3444_v20 }
  0xef   : > { %2987 = vmatprep.subr.bf16.mxu0 %v3446_v21 }
  0xf2   : > { %2988 = vmatpush3.bf16.msra.mxu0 %v3446_v21 }
  0xf3   : > { %2989 = vmatprep.subr.bf16.mxu0 %v3448_v24 }
  0xf6   : > { %2990 = vmatpush3.bf16.msra.mxu0 %v3448_v24 }
  0xf7   : > { %2991 = vmatprep.subr.bf16.mxu0 %v3450_v26 }
  0xfa   : > { %2992 = vmatpush3.bf16.msra.mxu0 %v3450_v26 }
  0xfb   : > { %3001 = vmatprep.subr.bf16.mxu0 %v3452_v28 }
 0x1b0   : > { %v2971_v32 = vpop.f32.mrb[0].mxu0 }
 0x1b1   : > { %v625_v33 = vadd.f32 %v2971_v32, %v2645_v31  ;;  %v616_v34 = vpop.f32.mrb[1].mxu0  ;;  %v3466_v32 = vld [vmem:[#allocation8 + $0x38] sm:$0xff]  }
 0x1b2   : > { %v617_v35 = vadd.f32 %v2645_v31, %v616_v34  ;;  %v2972_v36 = vpop.f32.mrb[2].mxu0 }
 0x1b3   : > { %v4170_v37 = vmax.f32 %v625_v33, 0.0  ;;  %v628_v38 = vadd.f32 %v2972_v36, %v2645_v31  ;;  %v619_v39 = vpop.f32.mrb[3].mxu0  ;;  %v3465_v33 = vld [vmem:[#allocation8 + $0xf0] sm:$0xff]  }
 0x1b4   : > { %v4172_v41 = vmax.f32 %v617_v35, 0.0  ;;  %v620_v42 = vadd.f32 %v2645_v31, %v619_v39  ;;  %v3467_v35 = vld [vmem:[#allocation8 + $0xf8] sm:$0xff]  }
 0x1b5   : > { %679 = vst [vmem:[#allocation2 + $0x31] sm:$0xff] %v4170_v37  ;;  %v4175_v43 = vmax.f32 %v628_v38, 0.0 }
 0x1b6   : > { %677 = vst [vmem:[#allocation2 + $0x11] sm:$0xff] %v4172_v41  ;;  %v4178_v44 = vmax.f32 %v620_v42, 0.0  ;;  %v721_v45 = vpack.c.bf16 %v4172_v41, %v713_v40  ;;  %v3468_v42 = vld [vmem:[#allocation8 + $0x100] sm:$0xff]  }
 0x1b7   : > { %680 = vst [vmem:[#allocation2 + $0x41] sm:$0xff] %v4175_v43  ;;  %v1277_v46 = vpack.c.bf16 %v4175_v43, %v4170_v37 }
 0x1b8   : > { %678 = vst [vmem:[#allocation2 + $0x21] sm:$0xff] %v4178_v44  ;;  %v2975_v47 = vpop.f32.mrb[4].mxu0  ;;  %2993 = vmatprep.mubr.bf16.mxu0 %v721_v45  ;;  %v4187_v48 = vpack.c.bf16 %v4170_v37, %v4178_v44  ;;  %v1276_v50 = vpack.c.bf16 %v4178_v44, %v4172_v41  ;;  %v3478_v41 = vld [vmem:[#allocation8 + $0x150] sm:$0xff]   ;;  %v3479_v44 = vld [vmem:[#allocation8 + $0x158] sm:$0xff]   ;;  %v3480_v37 = vld [vmem:[#allocation8 + $0x160] sm:$0xff]  }
 0x1b9   : > { %v641_v51 = vadd.f32 %v2975_v47, %v2645_v31  ;;  %v632_v52 = vpop.f32.mrb[5].mxu0 }
 0x1ba   : > { %v633_v53 = vadd.f32 %v2645_v31, %v632_v52  ;;  %v2976_v54 = vpop.f32.mrb[6].mxu0  ;;  %2994 = vmatmul.mubr.bf16.vlgmr.msra.gmra.mrb[8].mxu0 %v4187_v48 }
 0x1bb   : > { %v4192_v55 = vmax.f32 %v641_v51, 0.0  ;;  %v644_v56 = vadd.f32 %v2976_v54, %v2645_v31  ;;  %v635_v57 = vpop.f32.mrb[7].mxu0  ;;  %3002 = vmatpush3.bf16.msra.mxu0 %v3452_v28  ;;  %v3469_v51 = vld [vmem:[#allocation8 + $0x108] sm:$0xff]   ;;  %v3470_v54 = vld [vmem:[#allocation8 + $0x110] sm:$0xff]  }
 0x1bc   : > { %v4194_v59 = vmax.f32 %v633_v53, 0.0  ;;  %v636_v60 = vadd.f32 %v2645_v31, %v635_v57  ;;  %3003 = vmatprep.subr.bf16.mxu0 %v3454_v49  ;;  %v4205_v2 = vld [vmem:[#allocation2 + $0x32] sm:$0xff]  ;;  %v3463_v31 = vld [vmem:[#allocation8 + $0xe8] sm:$0xff]  }
 0x1bd   : > { %683 = vst [vmem:[#allocation2 + $0x71] sm:$0xff] %v4192_v55  ;;  %v4197_v61 = vmax.f32 %v644_v56, 0.0  ;;  %v4199_v62 = vld [vmem:[#allocation2 + $0x12] sm:$0xff] }
 0x1be   : > { %681 = vst [vmem:[#allocation2 + $0x51] sm:$0xff] %v4194_v59  ;;  %v4202_v0 = vmax.f32 %v636_v60, 0.0  ;;  %v976_v1 = vpack.c.bf16 %v4199_v62, %v968_v58  ;;  %v4209_v3 = vpack.c.bf16 %v4194_v59, %v4175_v43  ;;  %v4211_v4 = vld [vmem:[#allocation2 + $0x42] sm:$0xff]  ;;  %v686_v6 = vld [vmem:[#allocation2 + $0x10] sm:$0xff]  ;;  %v3471_v58 = vld [vmem:[#allocation8 + $0x118] sm:$0xff]  }
 0x1bf   : > { %684 = vst [vmem:[#allocation2 + $0x81] sm:$0xff] %v4197_v61  ;;  %v4214_v5 = vld [vmem:[#allocation2 + $0x22] sm:$0xff]  ;;  %3004 = vmatpush3.bf16.msra.mxu0 %v3454_v49  ;;  %v1279_v7 = vpack.c.bf16 %v4197_v61, %v4192_v55  ;;  %v1427_v8 = vpack.c.bf16 %v4211_v4, %v4205_v2  ;;  %v693_v15 = vpack.c.bf16 %v686_v6, %v3802_v22  ;;  %v688_v36 = vld [vmem:[#allocation2 + $0x30] sm:$0xff] }
 0x1c0   : > { %682 = vst [vmem:[#allocation2 + $0x61] sm:$0xff] %v4202_v0  ;;  %3041 = vmatprep.mubr.bf16.mxu1 %v976_v1  ;;  %v4223_v9 = vpack.c.bf16 %v4205_v2, %v4214_v5  ;;  %2997 = vmatprep.mubr.bf16.mxu0 %v4209_v3  ;;  %v4228_v11 = vpack.c.bf16 %v4192_v55, %v4202_v0  ;;  %v1119_v21 = vld [vmem:[#allocation2 + $0x20] sm:$0xff]  ;;  %v3474_v1 = vld [vmem:[#allocation8 + $0x130] sm:$0xff]   ;;  %v3481_v43 = vld [vmem:[#allocation8 + $0x168] sm:$0xff]  }
 0x1c1   : > { %3005 = vmatprep.subr.bf16.mxu0 %v3456_v63  ;;  %v1278_v13 = vpack.c.bf16 %v4202_v0, %v4194_v59  ;;  %v1426_v14 = vpack.c.bf16 %v4214_v5, %v4199_v62  ;;  %v1126_v26 = vpack.c.bf16 %v1119_v21, %v686_v6  ;;  %v4256_v38 = vpack.c.bf16 %v688_v36, %v1119_v21  ;;  %v1121_v39 = vld [vmem:[#allocation2 + $0x40] sm:$0xff]  ;;  %v3475_v6 = vld [vmem:[#allocation8 + $0x138] sm:$0xff]   ;;  %v3485_v59 = vld [vmem:[#allocation8 + $0x188] sm:$0xff]  }
 0x1c2   : > { %3042 = vmatmul.mubr.bf16.vlgmr.msra.gmra.mrb[0].mxu1 %v4223_v9  ;;  %2998 = vmatmul.mubr.bf16.gmra.mrb[12].mxu0 %v4228_v11  ;;  %v1127_v49 = vpack.c.bf16 %v1121_v39, %v688_v36  ;;  %v3472_v60 = vld [vmem:[#allocation8 + $0x120] sm:$0xff]   ;;  %v3486_v62 = vld [vmem:[#allocation8 + $0x190] sm:$0xff]   ;;  %v3497_v21 = vld [vmem:[#allocation8 + $0x1e8] sm:$0xff]  }
 0x1c3   : > { %3050 = vmatpush3.bf16.msra.mxu1 %v4164_v30  ;;  %3006 = vmatpush3.bf16.msra.mxu0 %v3456_v63  ;;  %v3464_v30 = vld [vmem:[#allocation8 + $0x30] sm:$0xff]   ;;  %v3473_v63 = vld [vmem:[#allocation8 + $0x128] sm:$0xff]   ;;  %v3484_v55 = vld [vmem:[#allocation8 + $0x180] sm:$0xff]  }
 0x1c4   : > { %3051 = vmatprep.subr.bf16.mxu1 %v3455_v10  ;;  %3017 = vmatprep.mubr.bf16.mxu0 %v693_v15  ;;  %v4240_v18 = vld [vmem:[#allocation2 + $0x72] sm:$0xff]  ;;  %v3488_v2 = vld [vmem:[#allocation8 + $0x1a0] sm:$0xff]   ;;  %v3493_v15 = vld [vmem:[#allocation8 + $0x1c8] sm:$0xff]  }
 0x1c5   : > { %v4238_v17 = vld [vmem:[#allocation2 + $0x52] sm:$0xff]  ;;  %3007 = vmatprep.subr.bf16.mxu0 %v3458_v12 }
 0x1c6   : > { %v4244_v20 = vpack.c.bf16 %v4238_v17, %v4211_v4  ;;  %v690_v34 = vld [vmem:[#allocation2 + $0x50] sm:$0xff]  ;;  %v4266_v56 = vld [vmem:[#allocation2 + $0x80] sm:$0xff]  ;;  %v3489_v4 = vld [vmem:[#allocation8 + $0x1a8] sm:$0xff]  }
 0x1c7   : > { %3052 = vmatpush3.bf16.msra.mxu1 %v3455_v10  ;;  %v4246_v23 = vld [vmem:[#allocation2 + $0x62] sm:$0xff]  ;;  %3008 = vmatpush3.bf16.msra.mxu0 %v3458_v12  ;;  %v4259_v40 = vpack.c.bf16 %v690_v34, %v1121_v39  ;;  %v692_v47 = vld [vmem:[#allocation2 + $0x70] sm:$0xff] }
 0x1c8   : > { %3045 = vmatprep.mubr.bf16.mxu1 %v4244_v20  ;;  %3053 = vmatprep.subr.bf16.mxu1 %v3457_v16  ;;  %v4251_v24 = vpack.c.bf16 %v4240_v18, %v4246_v23  ;;  %v1428_v28 = vpack.c.bf16 %v4246_v23, %v4238_v17  ;;  %v1123_v45 = vld [vmem:[#allocation2 + $0x60] sm:$0xff]  ;;  %v1129_v57 = vpack.c.bf16 %v4266_v56, %v692_v47  ;;  %v3477_v12 = vld [vmem:[#allocation8 + $0x148] sm:$0xff]   ;;  %v3498_v23 = vld [vmem:[#allocation8 + $0x1f0] sm:$0xff]  }
 0x1c9   : > { %3009 = vmatprep.subr.bf16.mxu0 %v3460_v19  ;;  %v1128_v52 = vpack.c.bf16 %v1123_v45, %v690_v34  ;;  %v4263_v53 = vpack.c.bf16 %v692_v47, %v1123_v45  ;;  %v3476_v10 = vld [vmem:[#allocation8 + $0x140] sm:$0xff]   ;;  %v1580_v17 = vpack.c.bf16 %v3802_v22, %v4266_v56  ;;  %v3509_v47 = vld [vmem:[#allocation9 + $0x8] sm:$0xff]  }
 0x1ca   : > { %3046 = vmatmul.mubr.bf16.gmra.mrb[4].mxu1 %v4251_v24  ;;  %v4290_v0 = vld [vmem:[#allocation2 + $0x82] sm:$0xff] }
 0x1cb   : > { %3054 = vmatpush3.bf16.msra.mxu1 %v3457_v16  ;;  %3065 = vmatprep.mubr.bf16.mxu1 %v1126_v26  ;;  %v1429_v5 = vpack.c.bf16 %v4290_v0, %v4240_v18  ;;  %v3494_v16 = vld [vmem:[#allocation8 + $0x1d0] sm:$0xff]   ;;  %v3495_v18 = vld [vmem:[#allocation8 + $0x1d8] sm:$0xff]   ;;  %v3500_v26 = vld [vmem:[#allocation8 + $0x200] sm:$0xff]  }
 0x1cc   : > { %3055 = vmatprep.subr.bf16.mxu1 %v3459_v25  ;;  %3010 = vmatpush3.bf16.msra.mxu0 %v3460_v19  ;;  %v3496_v19 = vld [vmem:[#allocation8 + $0x1e0] sm:$0xff]  }
 0x1cd   : > { %3011 = vmatprep.subr.bf16.mxu0 %v3462_v27  ;;  %v3508_v45 = vld [vmem:[#allocation9] sm:$0xff]  }
 0x1cf   : > { %3056 = vmatpush3.bf16.msra.mxu1 %v3459_v25  ;;  %v3499_v25 = vld [vmem:[#allocation8 + $0x1f8] sm:$0xff]  }
 0x1d0   : > { %3057 = vmatprep.subr.bf16.mxu1 %v3461_v29  ;;  %3012 = vmatpush3.bf16.msra.mxu0 %v3462_v27  ;;  %v3501_v27 = vld [vmem:[#allocation8 + $0x208] sm:$0xff]  }
 0x1d1   : > { %3013 = vmatprep.subr.bf16.mxu0 %v3464_v30 }
 0x1d3   : > { %3058 = vmatpush3.bf16.msra.mxu1 %v3461_v29 }
 0x1d4   : > { %3059 = vmatprep.subr.bf16.mxu1 %v3463_v31  ;;  %3014 = vmatpush3.bf16.msra.mxu0 %v3464_v30  ;;  %v3503_v30 = vld [vmem:[#allocation8 + $0x218] sm:$0xff]  }
 0x1d5   : > { %3015 = vmatprep.subr.bf16.mxu0 %v3466_v32 }
 0x1d7   : > { %3060 = vmatpush3.bf16.msra.mxu1 %v3463_v31  ;;  %v3504_v31 = vld [vmem:[#allocation8 + $0x220] sm:$0xff]  }
 0x1d8   : > { %3061 = vmatprep.subr.bf16.mxu1 %v3465_v33  ;;  %3016 = vmatpush3.bf16.msra.mxu0 %v3466_v32  ;;  %v3507_v32 = vld [vmem:[#allocation8 + $0x238] sm:$0xff]  }
 0x1d9   : > { %3193 = vmatprep.subr.bf16.mxu0 %v3802_v22 }
 0x1db   : > { %3062 = vmatpush3.bf16.msra.mxu1 %v3465_v33  ;;  %3018 = vmatmul.mubr.bf16.vlgmr.msra.gmra.mrb[8].mxu0 %v4256_v38 }
 0x1dc   : > { %3063 = vmatprep.subr.bf16.mxu1 %v3467_v35  ;;  %3021 = vmatprep.mubr.bf16.mxu0 %v4259_v40 }
 0x1dd   : > { %3194 = vmatpush3.bf16.msra.mxu0 %v3508_v45  ;;  %v3523_v45 = vld [vmem:[#allocation11 + $0x38] sm:$0xff]  }
 0x1de   : > { %3195 = vmatprep.subr.bf16.mxu0 %v3802_v22 }
 0x1df   : > { %3064 = vmatpush3.bf16.msra.mxu1 %v3467_v35 }
 0x1e0   : > { %3073 = vmatprep.subr.bf16.mxu1 %v3468_v42 }
 0x1e1   : > { %3196 = vmatpush3.bf16.msra.mxu0 %v3509_v47  ;;  %v2073_v47 = vld [vmem:[%s4456_s6] sm:$0x1] }
 0x1e2   : > { %3066 = vmatmul.mubr.bf16.vlgmr.msra.gmra.mrb[0].mxu1 %v1127_v49  ;;  %3197 = vmatprep.subr.bf16.mxu0 %v3802_v22  ;;  %v3512_v49 = vld [vmem:[#allocation9 + $0x20] sm:$0xff]  }
 0x1e3   : > { %3069 = vmatprep.mubr.bf16.mxu1 %v1128_v52  ;;  %3074 = vmatpush3.bf16.msra.mxu1 %v3468_v42  ;;  %v3514_v52 = vld [vmem:[#allocation9 + $0x30] sm:$0xff]  }
 0x1e4   : > { %3075 = vmatprep.subr.bf16.mxu1 %v3469_v51  ;;  %3022 = vmatmul.mubr.bf16.gmra.mrb[12].mxu0 %v4263_v53 }
 0x1e5   : > { %3209 = vmatprep.mubr.msk.bf16.mxu0 %vm3803_vm0, %v3802_v22 }
 0x1e7   : > { %3076 = vmatpush3.bf16.msra.mxu1 %v3469_v51  ;;  %v3513_v51 = vld [vmem:[#allocation9 + $0x28] sm:$0xff]  }
 0x1e8   : > { %3077 = vmatprep.subr.bf16.mxu1 %v3470_v54 }
 0x1ea   : > { %3070 = vmatmul.mubr.bf16.gmra.mrb[4].mxu1 %v1129_v57  ;;  %v2730_v57 = vld [vmem:[%s4454_s4] ss:$0 sm:$0xff] }
 0x1eb   : > { %3078 = vmatpush3.bf16.msra.mxu1 %v3470_v54  ;;  %3089 = vmatprep.mubr.bf16.mxu1 %v1276_v50  ;;  %v3483_v50 = vld [vmem:[#allocation8 + $0x178] sm:$0xff]  }
 0x1ec   : > { %3079 = vmatprep.subr.bf16.mxu1 %v3471_v58 }
 0x1ef   : > { %3080 = vmatpush3.bf16.msra.mxu1 %v3471_v58 }
 0x1f0   : > { %3081 = vmatprep.subr.bf16.mxu1 %v3472_v60 }
 0x1f3   : > { %3082 = vmatpush3.bf16.msra.mxu1 %v3472_v60 }
 0x1f4   : > { %3083 = vmatprep.subr.bf16.mxu1 %v3473_v63 }
 0x1f7   : > { %3084 = vmatpush3.bf16.msra.mxu1 %v3473_v63 }
 0x1f8   : > { %3085 = vmatprep.subr.bf16.mxu1 %v3474_v1 }
 0x1fb   : > { %3086 = vmatpush3.bf16.msra.mxu1 %v3474_v1 }
 0x1fc   : > { %3087 = vmatprep.subr.bf16.mxu1 %v3475_v6 }
 0x1ff   : > { %3088 = vmatpush3.bf16.msra.mxu1 %v3475_v6 }
 0x200   : > { %3097 = vmatprep.subr.bf16.mxu1 %v3476_v10 }
 0x202   : > { %3090 = vmatmul.mubr.bf16.vlgmr.msra.gmra.mrb[0].mxu1 %v1277_v46  ;;  %v3482_v46 = vld [vmem:[#allocation8 + $0x170] sm:$0xff]  }
 0x203   : > { %3093 = vmatprep.mubr.bf16.mxu1 %v1278_v13  ;;  %3098 = vmatpush3.bf16.msra.mxu1 %v3476_v10  ;;  %v3491_v13 = vld [vmem:[#allocation8 + $0x1b8] sm:$0xff]  }
 0x204   : > { %3099 = vmatprep.subr.bf16.mxu1 %v3477_v12 }
 0x207   : > { %3100 = vmatpush3.bf16.msra.mxu1 %v3477_v12 }
 0x208   : > { %3101 = vmatprep.subr.bf16.mxu1 %v3478_v41 }
 0x20a   : > { %3094 = vmatmul.mubr.bf16.gmra.mrb[4].mxu1 %v1279_v7  ;;  %v3487_v7 = vld [vmem:[#allocation8 + $0x198] sm:$0xff]  }
 0x20b   : > { %3102 = vmatpush3.bf16.msra.mxu1 %v3478_v41  ;;  %3113 = vmatprep.mubr.bf16.mxu1 %v1426_v14  ;;  %v3492_v14 = vld [vmem:[#allocation8 + $0x1c0] sm:$0xff]  }
 0x20c   : > { %3103 = vmatprep.subr.bf16.mxu1 %v3479_v44 }
 0x20f   : > { %3104 = vmatpush3.bf16.msra.mxu1 %v3479_v44 }
 0x210   : > { %3105 = vmatprep.subr.bf16.mxu1 %v3480_v37 }
 0x213   : > { %3106 = vmatpush3.bf16.msra.mxu1 %v3480_v37 }
 0x214   : > { %3107 = vmatprep.subr.bf16.mxu1 %v3481_v43 }
 0x217   : > { %3108 = vmatpush3.bf16.msra.mxu1 %v3481_v43 }
 0x218   : > { %3109 = vmatprep.subr.bf16.mxu1 %v3482_v46 }
 0x21b   : > { %3110 = vmatpush3.bf16.msra.mxu1 %v3482_v46 }
 0x21c   : > { %3111 = vmatprep.subr.bf16.mxu1 %v3483_v50 }
 0x21f   : > { %3112 = vmatpush3.bf16.msra.mxu1 %v3483_v50 }
 0x220   : > { %3121 = vmatprep.subr.bf16.mxu1 %v3484_v55 }
 0x222   : > { %3114 = vmatmul.mubr.bf16.vlgmr.msra.gmra.mrb[0].mxu1 %v1427_v8  ;;  %v3490_v8 = vld [vmem:[#allocation8 + $0x1b0] sm:$0xff]  }
 0x223   : > { %3117 = vmatprep.mubr.bf16.mxu1 %v1428_v28  ;;  %3122 = vmatpush3.bf16.msra.mxu1 %v3484_v55  ;;  %v1726_v28 = vld [vmem:[#allocation2 + $0x91] sm:$0xff] }
 0x224   : > { %3123 = vmatprep.subr.bf16.mxu1 %v3485_v59  ;;  %v1730_v29 = vpack.c.bf16 %v1726_v28, %v4197_v61  ;;  %v1876_v61 = vld [vmem:[#allocation2 + $0x92] sm:$0xff] }
 0x227   : > { %3124 = vmatpush3.bf16.msra.mxu1 %v3485_v59 }
 0x228   : > { %3125 = vmatprep.subr.bf16.mxu1 %v3486_v62 }
 0x22a   : > { %3118 = vmatmul.mubr.bf16.gmra.mrb[4].mxu1 %v1429_v5 }
 0x22b   : > { %3126 = vmatpush3.bf16.msra.mxu1 %v3486_v62  ;;  %3137 = vmatprep.mubr.bf16.mxu1 %v4256_v38 }
 0x22c   : > { %3127 = vmatprep.subr.bf16.mxu1 %v3487_v7 }
 0x22f   : > { %3128 = vmatpush3.bf16.msra.mxu1 %v3487_v7 }
 0x230   : > { %3129 = vmatprep.subr.bf16.mxu1 %v3488_v2 }
 0x233   : > { %3130 = vmatpush3.bf16.msra.mxu1 %v3488_v2 }
 0x234   : > { %3131 = vmatprep.subr.bf16.mxu1 %v3489_v4 }
 0x237   : > { %3132 = vmatpush3.bf16.msra.mxu1 %v3489_v4 }
 0x238   : > { %3133 = vmatprep.subr.bf16.mxu1 %v3490_v8 }
 0x23b   : > { %3134 = vmatpush3.bf16.msra.mxu1 %v3490_v8 }
 0x23c   : > { %3135 = vmatprep.subr.bf16.mxu1 %v3491_v13 }
 0x23f   : > { %3136 = vmatpush3.bf16.msra.mxu1 %v3491_v13 }
 0x240   : > { %3145 = vmatprep.subr.bf16.mxu1 %v3492_v14 }
 0x242   : > { %3138 = vmatmul.mubr.bf16.vlgmr.msra.gmra.mrb[0].mxu1 %v4259_v40 }
 0x243   : > { %3141 = vmatprep.mubr.bf16.mxu1 %v4263_v53  ;;  %3146 = vmatpush3.bf16.msra.mxu1 %v3492_v14  ;;  %v3515_v53 = vld [vmem:[#allocation9 + $0x38] sm:$0xff]  }
 0x244   : > { %3147 = vmatprep.subr.bf16.mxu1 %v3493_v15 }
 0x247   : > { %3148 = vmatpush3.bf16.msra.mxu1 %v3493_v15 }
 0x248   : > { %3149 = vmatprep.subr.bf16.mxu1 %v3494_v16 }
 0x24a   : > { %3142 = vmatmul.mubr.bf16.gmra.mrb[4].mxu1 %v1580_v17 }
 0x24b   : > { %3150 = vmatpush3.bf16.msra.mxu1 %v3494_v16  ;;  %3161 = vmatprep.mubr.bf16.mxu1 %v4187_v48  ;;  %v3502_v48 = vld [vmem:[#allocation8 + $0x210] sm:$0xff]  }
 0x24c   : > { %3151 = vmatprep.subr.bf16.mxu1 %v3495_v18 }
 0x24f   : > { %3152 = vmatpush3.bf16.msra.mxu1 %v3495_v18 }
 0x250   : > { %3153 = vmatprep.subr.bf16.mxu1 %v3496_v19 }
 0x253   : > { %3154 = vmatpush3.bf16.msra.mxu1 %v3496_v19 }
 0x254   : > { %3155 = vmatprep.subr.bf16.mxu1 %v3497_v21 }
 0x257   : > { %3156 = vmatpush3.bf16.msra.mxu1 %v3497_v21 }
 0x258   : > { %3157 = vmatprep.subr.bf16.mxu1 %v3498_v23 }
 0x25b   : > { %3158 = vmatpush3.bf16.msra.mxu1 %v3498_v23 }
 0x25c   : > { %3159 = vmatprep.subr.bf16.mxu1 %v3499_v25 }
 0x25f   : > { %3160 = vmatpush3.bf16.msra.mxu1 %v3499_v25 }
 0x260   : > { %3169 = vmatprep.subr.bf16.mxu1 %v3500_v26 }
 0x262   : > { %3162 = vmatmul.mubr.bf16.vlgmr.msra.gmra.mrb[0].mxu1 %v4209_v3  ;;  %v3505_v3 = vld [vmem:[#allocation8 + $0x228] sm:$0xff]  }
 0x263   : > { %3165 = vmatprep.mubr.bf16.mxu1 %v4228_v11  ;;  %3170 = vmatpush3.bf16.msra.mxu1 %v3500_v26  ;;  %v3506_v11 = vld [vmem:[#allocation8 + $0x230] sm:$0xff]  }
 0x264   : > { %3171 = vmatprep.subr.bf16.mxu1 %v3501_v27 }
 0x267   : > { %3172 = vmatpush3.bf16.msra.mxu1 %v3501_v27 }
 0x268   : > { %3173 = vmatprep.subr.bf16.mxu1 %v3502_v48 }
 0x26a   : > { %3166 = vmatmul.mubr.bf16.gmra.mrb[4].mxu1 %v1730_v29 }
 0x26b   : > { %3174 = vmatpush3.bf16.msra.mxu1 %v3502_v48  ;;  %3185 = vmatprep.mubr.bf16.mxu1 %v4223_v9  ;;  %v1880_v9 = vpack.c.bf16 %v1876_v61, %v4290_v0 }
 0x26c   : > { %3175 = vmatprep.subr.bf16.mxu1 %v3503_v30 }
 0x26f   : > { %3176 = vmatpush3.bf16.msra.mxu1 %v3503_v30 }
 0x270   : > { %3177 = vmatprep.subr.bf16.mxu1 %v3504_v31 }
 0x273   : > { %3178 = vmatpush3.bf16.msra.mxu1 %v3504_v31 }
 0x274   : > { %3179 = vmatprep.subr.bf16.mxu1 %v3505_v3 }
 0x277   : > { %3180 = vmatpush3.bf16.msra.mxu1 %v3505_v3 }
 0x278   : > { %3181 = vmatprep.subr.bf16.mxu1 %v3506_v11 }
 0x27b   : > { %3182 = vmatpush3.bf16.msra.mxu1 %v3506_v11 }
 0x27c   : > { %3183 = vmatprep.subr.bf16.mxu1 %v3507_v32 }
 0x27f   : > { %3184 = vmatpush3.bf16.msra.mxu1 %v3507_v32 }
 0x282   : > { %3186 = vmatmul.mubr.bf16.vlgmr.msra.gmra.mrb[0].mxu1 %v4244_v20  ;;  %v3510_v20 = vld [vmem:[#allocation9 + $0x10] sm:$0xff]  }
 0x283   : > { %3189 = vmatprep.mubr.bf16.mxu1 %v4251_v24  ;;  %3198 = vmatpush3.bf16.msra.mxu0 %v3510_v20  ;;  %v3511_v24 = vld [vmem:[#allocation9 + $0x18] sm:$0xff]  }
 0x284   : > { %3199 = vmatprep.subr.bf16.mxu0 %v3802_v22 }
 0x287   : > { %3200 = vmatpush3.bf16.msra.mxu0 %v3511_v24 }
 0x288   : > { %3201 = vmatprep.subr.bf16.mxu0 %v3802_v22 }
 0x28a   : > { %3190 = vmatmul.mubr.bf16.gmra.mrb[4].mxu1 %v1880_v9 }
 0x28b   : > { %3202 = vmatpush3.bf16.msra.mxu0 %v3512_v49 }
 0x28c   : > { %3203 = vmatprep.subr.bf16.mxu0 %v3802_v22 }
 0x28f   : > { %3204 = vmatpush3.bf16.msra.mxu0 %v3513_v51 }
 0x290   : > { %3205 = vmatprep.subr.bf16.mxu0 %v3802_v22 }
 0x293   : > { %3206 = vmatpush3.bf16.msra.mxu0 %v3514_v52 }
 0x294   : > { %3207 = vmatprep.subr.bf16.mxu0 %v3802_v22 }
 0x297   : > { %3208 = vmatpush3.bf16.msra.mxu0 %v3515_v53 }
 0x298   : > { %3213 = vmatprep.subr.bf16.mxu0 %v3802_v22 }
 0x2ae   : > { %v3019_v33 = vpop.f32.mrb[8].mxu0 }
 0x2af   : > { %v937_v34 = vpop.f32.mrb[9].mxu0 }
 0x2b0   : > { %v3020_v35 = vpop.f32.mrb[10].mxu0 }
 0x2b1   : > { %v940_v36 = vpop.f32.mrb[11].mxu0 }
 0x2b7   : > { %v3023_v38 = vpop.f32.mrb[12].mxu0 }
 0x2b8   : > { %v953_v39 = vpop.f32.mrb[13].mxu0 }
 0x2b9   : > { %v3024_v40 = vpop.f32.mrb[14].mxu0 }
 0x2ba   : > { %v956_v42 = vpop.f32.mrb[15].mxu0 }
 0x355   : > { %v3187_v54 = vpop.f32.mrb[0].mxu1 }
 0x356   : > { %v3257_v56 = vadd.f32 %v3187_v54, %v3019_v33  ;;  %v1980_v58 = vpop.f32.mrb[1].mxu1  ;;  %v3516_v33 = vld [vmem:[#allocation11] sm:$0xff]  }
 0x357   : > { %v3258_v60 = vadd.f32 %v1980_v58, %v937_v34  ;;  %v3188_v63 = vpop.f32.mrb[2].mxu1  ;;  %v3527_v58 = vld [vmem:[#allocation12 + $0x18] sm:$0xff]  }
 0x358   : > { %v3259_v1 = vadd.f32 %v3188_v63, %v3020_v35  ;;  %v1983_v6 = vpop.f32.mrb[3].mxu1  ;;  %v4322_v41 = vadd.f32 %v3257_v56, %v2730_v57  ;;  %v3517_v35 = vld [vmem:[#allocation11 + $0x8] sm:$0xff]   ;;  %v3524_v56 = vld [vmem:[#allocation12] sm:$0xff]  }
 0x359   : > { %v4320_v10 = vadd.f32 %v3258_v60, %v2730_v57  ;;  %v3260_v12 = vadd.f32 %v1983_v6, %v940_v36  ;;  %v3518_v36 = vld [vmem:[#allocation11 + $0x10] sm:$0xff]   ;;  %v3528_v60 = vld [vmem:[#allocation12 + $0x20] sm:$0xff]   ;;  %v3529_v63 = vld [vmem:[#allocation12 + $0x28] sm:$0xff]  }
 0x35a   : > { %v4327_v43 = vadd.f32 %v3259_v1, %v2730_v57  ;;  %v2036_v62 = vmax.f32 %v4322_v41, 0.0  ;;  %v3530_v1 = vld [vmem:[#allocation12 + $0x30] sm:$0xff]   ;;  %v3531_v6 = vld [vmem:[#allocation12 + $0x38] sm:$0xff]  }
 0x35b   : > { %v4324_v44 = vadd.f32 %v3260_v12, %v2730_v57  ;;  %v2034_v37 = vmax.f32 %v4320_v10, 0.0  ;;  %v2180_v12 = vld [vmem:[%s4488_s22] sm:$0x1]  ;;  %s3718_s22 = sshll.u32 %s3804_s28, 4  ;;  %s3719_s22 = int_to_ptr.vmem [resolvable:$false] %s3718_s22 }
 0x35c   : > { %v2037_v8 = vmax.f32 %v4327_v43, 0.0  ;;  %s3720_s30 = scalar_lea.vmem %s3719_s22, 1024 }
 0x35d   : > { %v2035_v46 = vmax.f32 %v4324_v44, 0.0  ;;  %v3191_v50 = vpop.f32.mrb[4].mxu1 }
 0x35e   : > { %v3261_v55 = vadd.f32 %v3191_v50, %v3023_v38  ;;  %v1996_v59 = vpop.f32.mrb[5].mxu1  ;;  %v3519_v38 = vld [vmem:[#allocation11 + $0x18] sm:$0xff]  }
 0x35f   : > { %v2042_v0 = vadd.f32 %v2035_v46, %v2034_v37  ;;  %v3262_v5 = vadd.f32 %v1996_v59, %v953_v39  ;;  %v3192_v7 = vpop.f32.mrb[6].mxu1  ;;  %v3520_v39 = vld [vmem:[#allocation11 + $0x20] sm:$0xff]  }
 0x360   : > { %v3263_v2 = vadd.f32 %v3192_v7, %v3024_v40  ;;  %v1999_v4 = vpop.f32.mrb[7].mxu1  ;;  %v4340_v16 = vadd.f32 %v3261_v55, %v2730_v57  ;;  %v3521_v40 = vld [vmem:[#allocation11 + $0x28] sm:$0xff]  }
 0x361   : > { %v2043_v13 = vadd.f32 %v2042_v0, %v2036_v62  ;;  %v4338_v14 = vadd.f32 %v3262_v5, %v2730_v57  ;;  %v3264_v15 = vadd.f32 %v1999_v4, %v956_v42  ;;  %v3522_v42 = vld [vmem:[#allocation11 + $0x30] sm:$0xff]  }
 0x362   : > { %v4349_v23 = vadd.f32 %v3263_v2, %v2730_v57  ;;  %v2040_v26 = vmax.f32 %v4340_v16, 0.0 }
 0x363   : > { %v2038_v17 = vmax.f32 %v4338_v14, 0.0  ;;  %v2044_v18 = vadd.f32 %v2043_v13, %v2037_v8  ;;  %v4345_v19 = vadd.f32 %v3264_v15, %v2730_v57  ;;  %v3525_v57 = vld [vmem:[#allocation12 + $0x8] sm:$0xff]   ;;  %v2275_v13 = vlaneseq  ;;  %v3541_v14 = vld [vmem:[%s4122_s27] sm:$0xff]  }
 0x364   : > { %v2041_v48 = vmax.f32 %v4349_v23, 0.0  ;;  %v2428_v16 = vunpack.c.h.bf16 %v3541_v14 }
 0x365   : > { %v2045_v21 = vadd.f32 %v2044_v18, %v2038_v17  ;;  %v2039_v25 = vmax.f32 %v4345_v19, 0.0  ;;  %v2276_v15 = vshrl.u32 %v2275_v13, 7 }
 0x367   : > { %v2046_v27 = vadd.f32 %v2045_v21, %v2039_v25  ;;  %v2277_v18 = vsub.s32 0, %v2276_v15 }
 0x369   : > { %v2047_v28 = vadd.f32 %v2046_v27, %v2040_v26 }
 0x36b   : > { %v2048_v29 = vadd.f32 %v2047_v28, %v2041_v48 }
 0x36d   : > { %v2049_v30 = vrot.slane %v2048_v29, 4 }
 0x36f   : > { %v2050_v31 = vadd.f32 %v2049_v30, %v2048_v29 }
 0x371   : > { %v2051_v3 = vrot.slane %v2050_v31, 2 }
 0x373   : > { %v2052_v11 = vadd.f32 %v2051_v3, %v2050_v31 }
 0x375   : > { %v2053_v32 = vrot.slane %v2052_v11, 1 }
 0x377   : > { %v2054_v61 = vadd.f32 %v2053_v32, %v2052_v11 }
 0x379   : > { %v2055_v9 = vmul.f32 0.015625, %v2054_v61 }
 0x37b   : > { %v2056_v34 = vpack.c.bf16 %v2055_v9, %v2055_v9 }
 0x37d   : > { %3210 = vmatmul.mubr.bf16.vlgmr.msra.gmra.mrb[16].mxu0 %v2056_v34 }
 0x37e   : > { %3214 = vmatpush3.bf16.msra.mxu0 %v3516_v33  ;;  %3229 = vmatprep.mubr.msk.bf16.mxu0 %vm3803_vm0, %v3802_v22 }
 0x37f   : > { %3215 = vmatprep.subr.bf16.mxu0 %v3802_v22 }
 0x382   : > { %3216 = vmatpush3.bf16.msra.mxu0 %v3517_v35 }
 0x383   : > { %3217 = vmatprep.subr.bf16.mxu0 %v3802_v22 }
 0x386   : > { %3218 = vmatpush3.bf16.msra.mxu0 %v3518_v36 }
 0x387   : > { %3219 = vmatprep.subr.bf16.mxu0 %v3802_v22 }
 0x38a   : > { %3220 = vmatpush3.bf16.msra.mxu0 %v3519_v38 }
 0x38b   : > { %3221 = vmatprep.subr.bf16.mxu0 %v3802_v22 }
 0x38e   : > { %3222 = vmatpush3.bf16.msra.mxu0 %v3520_v39 }
 0x38f   : > { %3223 = vmatprep.subr.bf16.mxu0 %v3802_v22 }
 0x392   : > { %3224 = vmatpush3.bf16.msra.mxu0 %v3521_v40 }
 0x393   : > { %3225 = vmatprep.subr.bf16.mxu0 %v3802_v22 }
 0x396   : > { %3226 = vmatpush3.bf16.msra.mxu0 %v3522_v42 }
 0x397   : > { %3227 = vmatprep.subr.bf16.mxu0 %v3802_v22  ;;  %v3526_v22 = vld [vmem:[#allocation12 + $0x10] sm:$0xff]  }
 0x39a   : > { %3228 = vmatpush3.bf16.msra.mxu0 %v3523_v45  ;;  %v3542_v45 = vld [vmem:[%s4122_s27 + $0x18] sm:$0xff]  }
 0x39b   : > { %3233 = vmatprep.subr.bf16.mxu0 %v3524_v56 }
 0x450   : > { %v2156_v20 = vpop.f32.mrb[16].mxu0 }
 0x451   : > { %v2157_v24 = vadd.f32 %v2156_v20, %v2073_v47  ;;  %v3211_v49 = vpop.f32.mrb[17].mxu0  ;;  %v2433_v47 = vunpack.c.l.bf16 %v3542_v45 }
 0x452   : > { %v2159_v51 = vpop.f32.mrb[18].mxu0 }
 0x453   : > { %v2162_v52 = vmax.f32 %v2157_v24, 0.0  ;;  %v3212_v53 = vpop.f32.mrb[19].mxu0  ;;  %v3543_v51 = vld [vmem:[%s4122_s27 + $0x10] sm:$0xff]  }
 0x455   : > { %v2163_v54 = vpack.c.bf16 %v2162_v52, %v2162_v52  ;;  %v2431_v52 = vunpack.c.l.bf16 %v3543_v51 }
 0x457   : > { %3230 = vmatmul.mubr.bf16.vlgmr.msra.gmra.mrb[20].mxu0 %v2163_v54 }
 0x458   : > { %3234 = vmatpush3.bf16.msra.mxu0 %v3524_v56 }
 0x459   : > { %3235 = vmatprep.subr.bf16.mxu0 %v3525_v57 }
 0x45c   : > { %3236 = vmatpush3.bf16.msra.mxu0 %v3525_v57  ;;  %v2434_v57 = vunpack.c.h.bf16 %v3542_v45 }
 0x45d   : > { %3237 = vmatprep.subr.bf16.mxu0 %v3526_v22 }
 0x460   : > { %3238 = vmatpush3.bf16.msra.mxu0 %v3526_v22 }
 0x461   : > { %3239 = vmatprep.subr.bf16.mxu0 %v3527_v58 }
 0x464   : > { %3240 = vmatpush3.bf16.msra.mxu0 %v3527_v58 }
 0x465   : > { %3241 = vmatprep.subr.bf16.mxu0 %v3528_v60 }
 0x468   : > { %3242 = vmatpush3.bf16.msra.mxu0 %v3528_v60 }
 0x469   : > { %3243 = vmatprep.subr.bf16.mxu0 %v3529_v63 }
 0x46c   : > { %3244 = vmatpush3.bf16.msra.mxu0 %v3529_v63  ;;  %v2432_v63 = vunpack.c.h.bf16 %v3543_v51 }
 0x46d   : > { %3245 = vmatprep.subr.bf16.mxu0 %v3530_v1 }
 0x470   : > { %3246 = vmatpush3.bf16.msra.mxu0 %v3530_v1 }
 0x471   : > { %3247 = vmatprep.subr.bf16.mxu0 %v3531_v6 }
 0x474   : > { %3248 = vmatpush3.bf16.msra.mxu0 %v3531_v6 }
 0x52a   : > { %v2263_v50 = vpop.f32.mrb[20].mxu0 }
 0x52b   : > { %v2264_v55 = vadd.f32 %v2263_v50, %v2180_v12  ;;  %v3231_v59 = vpop.f32.mrb[21].mxu0 }
 0x52c   : > { %v2266_v0 = vpop.f32.mrb[22].mxu0 }
 0x52d   : > { %v2747_v5 = vmul.f32 -1.442695, %v2264_v55  ;;  %v3232_v7 = vpop.f32.mrb[23].mxu0 }
 0x52f   : > { %3536 = vpow2.f32 %v2747_v5 }
 0x539   : > { %v3537_v2 = vpop.eup %3536 }
 0x53a   : > { %v2272_v4 = vadd.f32 1.0, %v3537_v2 }
 0x53c   : > { %3538 = vrcp.f32 %v2272_v4 }
 0x546   : > { %v3539_v21 = vpop.eup %3538 }
 0x547   : > { %v2278_v27 = vrot.slane %v3539_v21, %v2277_v18 }
 0x549   : > { %v2279_v28 = vmul.f32 %v2278_v27, %v2034_v37  ;;  %v2280_v29 = vmul.f32 %v2278_v27, %v2035_v46  ;;  %v2281_v30 = vmul.f32 %v2278_v27, %v2036_v62  ;;  %v2282_v31 = vmul.f32 %v2278_v27, %v2037_v8  ;;  %v2748_v46 = vld [vmem:[%s4489_s24] ss:$0 sm:$0xff]  ;;  %v3540_v62 = vld [vmem:[%s4122_s27 + $0x8] sm:$0xff]   ;;  %s2505_s27 = sshll.u32 %s477_s12, 4  ;;  %s4401_s27 = int_to_ptr.vmem [resolvable:$true] %s2505_s27 }
 0x54a   : > { %v2283_v3 = vmul.f32 %v2278_v27, %v2038_v17  ;;  %v2284_v11 = vmul.f32 %v2278_v27, %v2039_v25  ;;  %v2285_v41 = vmul.f32 %v2278_v27, %v2040_v26  ;;  %v2286_v44 = vmul.f32 %v2278_v27, %v2041_v48  ;;  %s3714_s23 = scalar_lea.vmem %s4401_s27, 512  ;;  %p3721_p13 = scmp.lt.s32.totalorder %s4401_s27, %s3719_s22 }
 0x54b   : > { %v2287_v32 = vpack.c.bf16 %v2280_v29, %v2279_v28  ;;  %v2288_v10 = vpack.c.bf16 %v2282_v31, %v2281_v30  ;;  %v2429_v8 = vunpack.c.l.bf16 %v3540_v62  ;;  %v2427_v17 = vunpack.c.l.bf16 %v3541_v14  ;;  %p3715_p7 = scmp.ne.s32.totalorder %s4401_s27, %s3714_s23  ;;  %p3722_p0 = scmp.lt.s32.totalorder %s3720_s30, %s3714_s23 }
 0x54c   : > { %v2289_v37 = vpack.c.bf16 %v2284_v11, %v2283_v3  ;;  %v2290_v43 = vpack.c.bf16 %v2286_v44, %v2285_v41  ;;  %v2430_v9 = vunpack.c.h.bf16 %v3540_v62 }
 0x54d   : > { %3249 = vmatprep.mubr.bf16.mxu0 %v2287_v32  ;;  %p3716_p12 = pnand %p3715_p7, %p4491_p4  ;;  %p3723_p2 = por %p3722_p0, %p3721_p13 }
 0x54e   : > { %3250 = vmatmul.mubr.bf16.vlgmr.msra.gmra.mrb[24].mxu0 %v2288_v10 }
 0x54f   : > { %3253 = vmatprep.mubr.bf16.mxu0 %v2289_v37  ;;  %p3717_p1 = pneg %p3716_p12 }
 0x551   : > { %p3724_p8 = pnand %p3723_p2, %p3717_p1 }
 0x556   : > { %3254 = vmatmul.mubr.bf16.gmra.mrb[28].mxu0 %v2290_v43 }
 0x621   : > { %v3251_v19 = vpop.f32.mrb[24].mxu0 }
 0x622   : > { %v2405_v25 = vadd.f32 %v3251_v19, %v2748_v46  ;;  %v2396_v61 = vpop.f32.mrb[25].mxu0 }
 0x623   : > { %v2397_v26 = vadd.f32 %v2748_v46, %v2396_v61  ;;  %v3252_v23 = vpop.f32.mrb[26].mxu0 }
 0x624   : > { %v2437_v48 = vadd.f32 %v2429_v8, %v2405_v25  ;;  %v2408_v33 = vadd.f32 %v3252_v23, %v2748_v46  ;;  %v2399_v34 = vpop.f32.mrb[27].mxu0 }
 0x625   : > { %v2435_v35 = vadd.f32 %v2427_v17, %v2397_v26  ;;  %v2400_v36 = vadd.f32 %v2748_v46, %v2399_v34 }
 0x626   : > { %v2438_v38 = vadd.f32 %v2430_v9, %v2408_v33  ;;  %v2445_v40 = vmax.f32 %v2437_v48, 0.0 }
 0x627   : > { %v2436_v39 = vadd.f32 %v2428_v16, %v2400_v36  ;;  %v2443_v20 = vmax.f32 %v2435_v35, 0.0 }
 0x628   : > { %v2446_v42 = vmax.f32 %v2438_v38, 0.0 }
 0x629   : > { %v2444_v24 = vmax.f32 %v2436_v39, 0.0  ;;  %v3255_v49 = vpop.f32.mrb[28].mxu0 }
 0x62a   : > { %v2788_v53 = vpack.c.bf16 %v2446_v42, %v2445_v40  ;;  %v2421_v54 = vadd.f32 %v3255_v49, %v2748_v46  ;;  %v2412_v56 = vpop.f32.mrb[29].mxu0 }
 0x62b   : > { %v2783_v22 = vpack.c.bf16 %v2444_v24, %v2443_v20  ;;  %v2413_v58 = vadd.f32 %v2748_v46, %v2412_v56  ;;  %v3256_v60 = vpop.f32.mrb[30].mxu0 }
 0x62c   : > { %2800 = vst [vmem:[%s477_s12 + $0x8] sm:$0xff] %v2788_v53   ;;  %v2441_v1 = vadd.f32 %v2433_v47, %v2421_v54  ;;  %v2424_v6 = vadd.f32 %v3256_v60, %v2748_v46  ;;  %v2415_v12 = vpop.f32.mrb[31].mxu0 }
 0x62d   : > { %2784 = vst [vmem:[%s477_s12] sm:$0xff] %v2783_v22   ;;  %v2439_v50 = vadd.f32 %v2431_v52, %v2413_v58  ;;  %v2416_v55 = vadd.f32 %v2748_v46, %v2415_v12 }
 0x62e   : > { %v2442_v59 = vadd.f32 %v2434_v57, %v2424_v6  ;;  %v2449_v5 = vmax.f32 %v2441_v1, 0.0 }
 0x62f   : > { %v2440_v0 = vadd.f32 %v2432_v63, %v2416_v55  ;;  %v2447_v2 = vmax.f32 %v2439_v50, 0.0 }
 0x630   : > { %v2450_v7 = vmax.f32 %v2442_v59, 0.0 }
 0x631   : > { %v2448_v4 = vmax.f32 %v2440_v0, 0.0 }
 0x632   : > { %v2798_v13 = vpack.c.bf16 %v2450_v7, %v2449_v5 }
 0x633   : > { %v2793_v15 = vpack.c.bf16 %v2448_v4, %v2447_v2 }
 0x634   : > { %2802 = vst [vmem:[%s477_s12 + $0x18] sm:$0xff] %v2798_v13  }
 0x635   : > { %2801 = vst [vmem:[%s477_s12 + $0x10] sm:$0xff] %v2793_v15  }
 0x636   : > { %3727 = shalt.err (!%p3724_p8)
}
 0x637   : > { %s3728_s15 = scalar_lea.hbm %s4406_s8, 512  ;;  %s3732_s13 = scalar_lea.hbm %s4490_s1, 1024 }
 0x638   : > { %p3729_p6 = scmp.ne.s32.totalorder %s4406_s8, %s3728_s15  ;;  %p3733_p3 = scmp.lt.u32.totalorder %s4406_s8, %s4490_s1 }
 0x639   : > { %p3734_p5 = scmp.lt.u32.totalorder %s3732_s13, %s3728_s15  ;;  %p3736_p7 = scmp.lt.u32.totalorder %s3728_s15, %s4406_s8 }
 0x63a   : > { %p3730_p10 = pnand %p3729_p6, %p4491_p4 }
 0x63b   : > { %p3735_p9 = por %p3734_p5, %p3733_p3 }
 0x63c   : > { %p3731_p11 = pneg %p3730_p10 }
 0x63d   : > { %p3737_p12 = por %p3736_p7, %p3735_p9 }
 0x63f   : > { %p3738_p1 = pnand %p3737_p12, %p3731_p11 }
 0x641   : > { %3741 = shalt.err (!%p3738_p1)
}
 0x642   : > { %s3805_s23 = smov 64   ;;  %s3806_s28 = smov 4  }
 0x643   : > { %3343 = dma.vmem_to_hbm [thread:$0]  (%p4491_p4), %s4401_s27, 512, %s4406_s8, %s2492_s25, %s3805_s23, %s3805_s23, %s3806_s28  }
 0x644 PF: > { %s2520_s22 = sand.u32 1, %s3780_s17   ;;  %p4492_p13 = scmp.ne.s32.totalorder %s4478_s21, 0 }
 0x645   : > { %p4493_p0 = scmp.ge.s32.totalorder %s3792_s20, 2  ;;  %s2521_s30 = scalar_lea.sflag [#allocation5], %s2520_s22 }
 0x647   : > { %p3366_p2 = pnand %p4493_p0, %p4492_p13 }
 0x649   : > { %3775 = dma.done.wait (!%p3366_p2), %s2521_s30, 512  }
 0x64a   : > { %3777 = vsyncadd (!%p3366_p2), %s2521_s30, 4294966784  ;;  %p27_p8 = scmp.ge.s32.totalorder %s4040_s16, 4   ;;  %s4494_s17 = smov %s3784_s18 }
 0x64b   : > { %s4495_s18 = smov %s3788_s19  ;;  %s4496_s19 = smov %s4052_s10 }
 0x64c   : > { %s4497_s20 = smov %s4040_s16  ;;  %29 = sbr.rel (!%p27_p8) target bundleno = 13 (0xd), region = 140 }
 0x653   :  { %2526 = vsyncpa [#allocation4], 1 }
 0x654   :  { %2528 = vsyncpa [#allocation4 + $0x1], 1 }
 0x655   :  { %2529 = vsyncpa [#allocation7], 1 }
 0x656   :  { %2530 = vsyncpa [#allocation10], 1 }
 0x657   :  { %2531 = vsyncpa [#allocation13], 1 }
 0x658   :  { %2532 = vsyncpa [#allocation5], 1 }
 0x659   :  { %2534 = vsyncpa [#allocation5 + $0x1], 1 }

</bundles_post_ra>
